<compile_context>
chip_gen: v6e
topology: v6e:2x2x1
jax: 0.10.0
libtpu: 0.0.40
codegen_flags: <defaults>
</compile_context>

<pallas_src>
import functools

import jax
import jax.numpy as jnp
import numpy as np
from jax import lax
from jax.experimental import pallas as pl
from jax.experimental.pallas import tpu as pltpu


def _round_up(x, m):
    return (x + m - 1) // m * m


def _cnn_kernel(ids_ref, tbl_ref, w_ref, cb_ref, mask_ref, wfc_ref, bfc_ref,
                out_ref, x_ref, *, TB, L, D, max_fs, K_pad):
    """One batch tile: embed (one-hot matmul) + conv (single im2col matmul)
    + fused bias/ReLU/mask/max-pool-over-time + Linear."""
    M = TB * L
    V_pad = tbl_ref.shape[0]
    NFp = w_ref.shape[-1]

    # ---- fused embedding lookup: one-hot compare (VPU) + MXU matmul ----
    ids = ids_ref[...]                                               # int32 [TB, L]
    vocab_iota = lax.broadcasted_iota(jnp.int32, (TB, L, V_pad), 2)
    one_hot = jnp.where(ids[..., None] == vocab_iota, 1.0, 0.0)      # f32 [TB, L, V_pad]
    one_hot = one_hot.reshape(M, V_pad).astype(jnp.bfloat16)         # free regroup (L % 8 == 0)
    emb = jnp.dot(one_hot, tbl_ref[...],
                  preferred_element_type=jnp.float32)                # f32 [M, D]

    # ---- im2col along the contraction dim: shifted copies of the INPUT ----
    # x_ref[r, j*D:(j+1)*D] = emb[(r + j) mod M]; rows that wrap across a batch
    # element's boundary only feed time positions the validity mask kills below.
    x_ref[:, 0:D] = emb.astype(jnp.bfloat16)
    for j in range(1, max_fs):
        shifted = pltpu.roll(emb, shift=M - j, axis=0)               # emb[r + j]
        x_ref[:, j * D:(j + 1) * D] = shifted.astype(jnp.bfloat16)
    if K_pad > max_fs * D:
        # zero the K-padding lanes every step (scratch is uninitialized / per-core)
        x_ref[:, max_fs * D:] = jnp.zeros((M, K_pad - max_fs * D), jnp.bfloat16)

    # ---- whole conv bank as ONE lane-dense MXU matmul ----
    acc = jnp.dot(x_ref[...], w_ref[...],
                  preferred_element_type=jnp.float32)                # f32 [M, NFp]
    acc = acc.reshape(TB, L, NFp)                                    # free (L % 8 == 0)

    # fused bias + ReLU + multiplicative 0/1 validity mask + max-pool over time.
    relu = jnp.maximum(acc + cb_ref[...], 0.0)                       # bias broadcast
    pooled = jnp.max(relu * mask_ref[...], axis=1)                   # [TB, NFp]; ok: ReLU >= 0

    # Dropout = identity (eval mode).  Final Linear on the lane-padded feature slab.
    out = jnp.dot(pooled.astype(wfc_ref.dtype), wfc_ref[...],
                  preferred_element_type=jnp.float32) + bfc_ref[...]
    out_ref[...] = out.astype(out_ref.dtype)


def cnn_forward(x_tokens, params, filter_sizes, *, batch_tile=128,
                vmem_budget_bytes=24 << 20):
    """x_tokens: int32 [seq_len, batch]  ->  logits [batch, output_dim]."""
    emb_table = params["embedding"]               # [V, D]
    conv_ws = params["conv_w"]                    # list of [F, 1, fs, D]
    conv_bs = params["conv_b"]                    # list of [F]
    fc_w = params["fc_w"]                         # [O, nconv*F]
    fc_b = params["fc_b"]                         # [O]

    L, B = x_tokens.shape
    V, D = emb_table.shape
    F = conv_ws[0].shape[0]
    nconv = len(filter_sizes)
    NF = nconv * F
    O = fc_w.shape[0]
    max_fs = max(filter_sizes)
    assert L >= max_fs, "sequence length must be >= the largest filter size"

    L_pad = _round_up(L, 8)                  # keeps reshape / time-pool tile-aligned
    V_pad = _round_up(V, 128)
    NF_pad = _round_up(NF, 128)
    O_pad = _round_up(O, 128)
    K_pad = _round_up(max_fs * D, 128)       # aligned MXU contraction depth

    # ---- batch tile: multiple of 8, VMEM-budgeted, >= 4 grid steps when possible ----
    def vmem_per_tile(tb):
        m = tb * L_pad
        lane = 128
        resident = (V_pad * lane * 2 + K_pad * NF_pad * 2 + 8 * NF_pad * 4
                    + L_pad * NF_pad * 2 + NF_pad * O_pad * 2 + 8 * O_pad * 4)
        streamed = tb * _round_up(L_pad, lane) * 4 + tb * O_pad * 4
        temps = (m * V_pad * 6               # one-hot (f32 + bf16 copy)
                 + m * lane * 4              # embedded block (f32, lane-padded)
                 + m * K_pad * 2             # im2col scratch
                 + 2 * m * NF_pad * 4)       # conv accumulator + fused epilogue temp
        return 2 * (resident + streamed) + temps

    B8 = _round_up(B, 8)
    TB = min(batch_tile, max(8, _round_up(pl.cdiv(B8, 4), 8)))   # aim for >= 4 grid steps
    while TB > 8 and vmem_per_tile(TB) > vmem_budget_bytes:
        TB = max(8, _round_up(TB // 2, 8))
    B_pad = _round_up(B, TB)
    n_blocks = B_pad // TB
    M = TB * L_pad

    # ---- token ids: [L, B] -> padded [B_pad, L_pad] int32 ----
    ids = x_tokens.transpose().astype(jnp.int32)
    ids = jnp.pad(ids, ((0, B_pad - B), (0, L_pad - L)))

    # ---- embedding table: lane-aligned vocab, bf16, VMEM-resident ----
    tbl = jnp.zeros((V_pad, D), jnp.float32).at[:V, :].set(emb_table).astype(jnp.bfloat16)

    # ---- pack all conv banks into ONE im2col weight [K_pad, NF_pad] (+ bias) ----
    w_np = np.zeros((max_fs, D, NF_pad), np.float32)
    cb_np = np.zeros((1, NF_pad), np.float32)
    fs_col = np.ones((NF_pad,), np.int32)          # pad columns: always "valid" (zero weights)
    for ci, (w, b, fs) in enumerate(zip(conv_ws, conv_bs, filter_sizes)):
        wt = np.transpose(np.asarray(w)[:, 0, :, :], (1, 2, 0))   # [fs, D, F]
        w_np[:fs, :, ci * F:(ci + 1) * F] = wt
        cb_np[0, ci * F:(ci + 1) * F] = np.asarray(b)
        fs_col[ci * F:(ci + 1) * F] = fs
    w_packed_np = np.zeros((K_pad, NF_pad), np.float32)
    w_packed_np[:max_fs * D, :] = w_np.reshape(max_fs * D, NF_pad)
    w_packed = jnp.asarray(w_packed_np, dtype=jnp.bfloat16)
    cb = jnp.asarray(cb_np)

    # multiplicative 0/1 validity mask over (time, filter column): valid iff t <= L - fs
    t_idx = np.arange(L_pad, dtype=np.int32)[:, None]
    mask_np = (t_idx <= (L - fs_col)[None, :]).astype(np.float32)
    mask = jnp.asarray(mask_np, dtype=jnp.bfloat16)                 # [L_pad, NF_pad]

    # ---- lane-padded FC params ----
    wfc_np = np.zeros((NF_pad, O_pad), np.float32)
    wfc_np[:NF, :O] = np.asarray(fc_w).T
    wfc = jnp.asarray(wfc_np, dtype=jnp.bfloat16)
    bfc_np = np.zeros((1, O_pad), np.float32)
    bfc_np[0, :O] = np.asarray(fc_b)
    bfc = jnp.asarray(bfc_np)

    kernel = functools.partial(_cnn_kernel, TB=TB, L=L_pad, D=D, max_fs=max_fs,
                               K_pad=K_pad)

    flops = (2 * B_pad * L_pad * V_pad * D          # one-hot embedding matmul
             + 2 * B_pad * L_pad * K_pad * NF_pad   # conv (im2col) matmul
             + 2 * B_pad * NF_pad * O_pad)          # FC matmul
    bytes_accessed = (ids.size * 4 + tbl.size * 2 + w_packed.size * 2 + cb.size * 4
                      + mask.size * 2 + wfc.size * 2 + bfc.size * 4 + B_pad * O_pad * 4)
    vmem_limit = int(min(max(32 << 20, 2 * vmem_per_tile(TB)), 48 << 20))

    out = pl.pallas_call(
        kernel,
        out_shape=jax.ShapeDtypeStruct((B_pad, O_pad), jnp.float32),
        grid=(n_blocks,),
        in_specs=[
            pl.BlockSpec((TB, L_pad), lambda i: (i, 0)),         # token ids (batch tiled)
            # Constant-index operands stay VMEM-resident across the grid.
            # TODO(synk): pipeline_mode=pl.Buffered(1) on these once single-buffer
            #             pipelining is verified on all target generations.
            pl.BlockSpec((V_pad, D), lambda i: (0, 0)),          # embedding table
            pl.BlockSpec((K_pad, NF_pad), lambda i: (0, 0)),     # packed im2col conv W
            pl.BlockSpec((1, NF_pad), lambda i: (0, 0)),         # conv bias
            pl.BlockSpec((L_pad, NF_pad), lambda i: (0, 0)),     # 0/1 validity mask
            pl.BlockSpec((NF_pad, O_pad), lambda i: (0, 0)),     # FC weight
            pl.BlockSpec((1, O_pad), lambda i: (0, 0)),          # FC bias
        ],
        out_specs=pl.BlockSpec((TB, O_pad), lambda i: (i, 0)),
        scratch_shapes=[pltpu.VMEM((M, K_pad), jnp.bfloat16)],   # im2col staging buffer
        compiler_params=pltpu.CompilerParams(
            dimension_semantics=("parallel",),
            vmem_limit_bytes=vmem_limit),
        cost_estimate=pl.CostEstimate(flops=flops, transcendentals=0,
                                      bytes_accessed=bytes_accessed),
    )(ids, tbl, w_packed, cb, mask, wfc, bfc)

    return out[:B, :O]


def cnn_forward_ref(x_tokens, params, filter_sizes):
    """Pure-JAX f32 reference of the PyTorch forward (eval mode)."""
    xb = x_tokens.transpose()
    emb = jnp.take(params["embedding"], xb, axis=0)       # [B, L, D]
    L = emb.shape[1]
    pooled = []
    for w, b, fs in zip(params["conv_w"], params["conv_b"], filter_sizes):
        l_out = L - fs + 1
        windows = jnp.stack([emb[:, j:j + l_out, :] for j in range(fs)], axis=2)  # [B,Lo,fs,D]
        conv = jnp.einsum("btjd,fjd->btf", windows, w[:, 0]) + b
        conv = jnp.maximum(conv, 0.0)
        pooled.append(conv.max(axis=1))
    cat = jnp.concatenate(pooled, axis=-1)
    return cat @ params["fc_w"].T + params["fc_b"]


if __name__ == "__main__":
    # model hyper-params (small, consistent with the module's __init__)
    vocab_size = 50
    embedding_dim = 32
    n_filters = 8
    filter_sizes = (3, 4, 5)
    output_dim = 2
    seq_len = 16
    batch = 2

    key = jax.random.PRNGKey(0)
    ks = jax.random.split(key, 4 + 2 * len(filter_sizes))

    params = {
        "embedding": 0.1 * jax.random.normal(ks[0], (vocab_size, embedding_dim), jnp.float32),
        "conv_w": [
            0.1 * jax.random.normal(ks[1 + i], (n_filters, 1, fs, embedding_dim), jnp.float32)
            for i, fs in enumerate(filter_sizes)
        ],
        "conv_b": [
            0.05 * jax.random.normal(ks[1 + len(filter_sizes) + i], (n_filters,), jnp.float32)
            for i in range(len(filter_sizes))
        ],
        "fc_w": 0.1 * jax.random.normal(
            ks[-3], (output_dim, len(filter_sizes) * n_filters), jnp.float32
        ),
        "fc_b": 0.05 * jax.random.normal(ks[-2], (output_dim,), jnp.float32),
    }

    # token ids: [seq_len, batch] (the module permutes to [batch, seq_len])
    x = jax.random.randint(ks[-1], (seq_len, batch), 0, vocab_size, dtype=jnp.int32)

    out = cnn_forward(x, params, filter_sizes)
    out = jax.block_until_ready(out)

    ref = cnn_forward_ref(x, params, filter_sizes)
    assert out.shape == (batch, output_dim)
    # Kernel feeds the MXU in bf16 (f32 accumulation); tolerance covers bf16 quantization.
    assert jnp.allclose(out, ref, atol=2e-2, rtol=2e-2), (out, ref)

    print("KERNEL_OK")
</pallas_src>

<mosaic_0001>
module attributes {stable_mosaic.version = 11 : i64} {
  func.func @_cnn_kernel(%arg0: i32, %arg1: memref<8x16xi32, #tpu.memory_space<vmem>>, %arg2: memref<128x32xbf16, #tpu.memory_space<vmem>>, %arg3: memref<256x128xbf16, #tpu.memory_space<vmem>>, %arg4: memref<1x128xf32, #tpu.memory_space<vmem>>, %arg5: memref<16x128xbf16, #tpu.memory_space<vmem>>, %arg6: memref<128x128xbf16, #tpu.memory_space<vmem>>, %arg7: memref<1x128xf32, #tpu.memory_space<vmem>>, %arg8: memref<8x128xf32, #tpu.memory_space<vmem>>, %arg9: memref<128x256xbf16, #tpu.memory_space<vmem>>) attributes {dimension_semantics = [#tpu.dimension_semantics<parallel>], iteration_bounds = array<i64: 1>, scalar_prefetch = 0 : i64, scratch_operands = 1 : i64, tpu.core_type = #tpu.core_type<tc>, window_params = [{transform_indices = @transform_0, window_bounds = array<i64: 8, 16>}, {pipeline_mode = #tpu.pipeline_mode<synchronous>, transform_indices = @transform_1, window_bounds = array<i64: 128, 32>}, {pipeline_mode = #tpu.pipeline_mode<synchronous>, transform_indices = @transform_2, window_bounds = array<i64: 256, 128>}, {pipeline_mode = #tpu.pipeline_mode<synchronous>, transform_indices = @transform_3, window_bounds = array<i64: 1, 128>}, {pipeline_mode = #tpu.pipeline_mode<synchronous>, transform_indices = @transform_4, window_bounds = array<i64: 16, 128>}, {pipeline_mode = #tpu.pipeline_mode<synchronous>, transform_indices = @transform_5, window_bounds = array<i64: 128, 128>}, {pipeline_mode = #tpu.pipeline_mode<synchronous>, transform_indices = @transform_6, window_bounds = array<i64: 1, 128>}, {transform_indices = @transform_7, window_bounds = array<i64: 8, 128>}]} {
    %c0 = arith.constant 0 : index
    %c0_0 = arith.constant 0 : index
    %0 = vector.load %arg1[%c0, %c0_0] : memref<8x16xi32, #tpu.memory_space<vmem>>, vector<8x16xi32>
    %1 = tpu.iota {dimensions = array<i32: 2>} : vector<8x16x128xi32>
    %2 = vector.shape_cast %0 : vector<8x16xi32> to vector<8x16x1xi32>
    %3 = vector.broadcast %2 : vector<8x16x1xi32> to vector<8x16x128xi32>
    %4 = arith.cmpi eq, %3, %1 : vector<8x16x128xi32>
    %cst = arith.constant 1.000000e+00 : f32
    %cst_1 = arith.constant 0.000000e+00 : f32
    %5 = vector.broadcast %cst : f32 to vector<8x16x128xf32>
    %6 = vector.broadcast %cst_1 : f32 to vector<8x16x128xf32>
    %7 = arith.select %4, %5, %6 : vector<8x16x128xi1>, vector<8x16x128xf32>
    %8 = vector.shape_cast %7 : vector<8x16x128xf32> to vector<128x128xf32>
    %9 = arith.truncf %8 : vector<128x128xf32> to vector<128x128xbf16>
    %c0_2 = arith.constant 0 : index
    %c0_3 = arith.constant 0 : index
    %10 = vector.load %arg2[%c0_2, %c0_3] : memref<128x32xbf16, #tpu.memory_space<vmem>>, vector<128x32xbf16>
    %cst_4 = arith.constant dense<0.000000e+00> : vector<128x32xf32>
    %11 = tpu.matmul %9, %10, %cst_4 {dimension_numbers = #tpu.dot_dimension_numbers<[1], [0], [0], [1], [0, 0, 1, 1], [], []>} : vector<128x128xbf16>, vector<128x32xbf16>, vector<128x32xf32> -> vector<128x32xf32>
    %12 = arith.truncf %11 : vector<128x32xf32> to vector<128x32xbf16>
    %c0_5 = arith.constant 0 : index
    %c0_6 = arith.constant 0 : index
    %13 = vector.load %arg9[%c0_5, %c0_6] : memref<128x256xbf16, #tpu.memory_space<vmem>>, vector<128x32xbf16>
    tpu.vector_store %arg9[%c0_5, %c0_6], %12 {strides = array<i32>} : memref<128x256xbf16, #tpu.memory_space<vmem>>, vector<128x32xbf16>,
    %c127_i32 = arith.constant 127 : i32
    %14 = tpu.dynamic_rotate %11 by %c127_i32 dim 0 : vector<128x32xf32>, i32 -> vector<128x32xf32>
    %15 = arith.truncf %14 : vector<128x32xf32> to vector<128x32xbf16>
    %c0_7 = arith.constant 0 : index
    %c32 = arith.constant 32 : index
    %16 = vector.load %arg9[%c0_7, %c32] : memref<128x256xbf16, #tpu.memory_space<vmem>>, vector<128x32xbf16>
    tpu.vector_store %arg9[%c0_7, %c32], %15 {strides = array<i32>} : memref<128x256xbf16, #tpu.memory_space<vmem>>, vector<128x32xbf16>,
    %c126_i32 = arith.constant 126 : i32
    %17 = tpu.dynamic_rotate %11 by %c126_i32 dim 0 : vector<128x32xf32>, i32 -> vector<128x32xf32>
    %18 = arith.truncf %17 : vector<128x32xf32> to vector<128x32xbf16>
    %c0_8 = arith.constant 0 : index
    %c64 = arith.constant 64 : index
    %19 = vector.load %arg9[%c0_8, %c64] : memref<128x256xbf16, #tpu.memory_space<vmem>>, vector<128x32xbf16>
    tpu.vector_store %arg9[%c0_8, %c64], %18 {strides = array<i32>} : memref<128x256xbf16, #tpu.memory_space<vmem>>, vector<128x32xbf16>,
    %c125_i32 = arith.constant 125 : i32
    %20 = tpu.dynamic_rotate %11 by %c125_i32 dim 0 : vector<128x32xf32>, i32 -> vector<128x32xf32>
    %21 = arith.truncf %20 : vector<128x32xf32> to vector<128x32xbf16>
    %c0_9 = arith.constant 0 : index
    %c96 = arith.constant 96 : index
    %22 = vector.load %arg9[%c0_9, %c96] : memref<128x256xbf16, #tpu.memory_space<vmem>>, vector<128x32xbf16>
    tpu.vector_store %arg9[%c0_9, %c96], %21 {strides = array<i32>} : memref<128x256xbf16, #tpu.memory_space<vmem>>, vector<128x32xbf16>,
    %c124_i32 = arith.constant 124 : i32
    %23 = tpu.dynamic_rotate %11 by %c124_i32 dim 0 : vector<128x32xf32>, i32 -> vector<128x32xf32>
    %24 = arith.truncf %23 : vector<128x32xf32> to vector<128x32xbf16>
    %c0_10 = arith.constant 0 : index
    %c128 = arith.constant 128 : index
    %25 = vector.load %arg9[%c0_10, %c128] : memref<128x256xbf16, #tpu.memory_space<vmem>>, vector<128x32xbf16>
    tpu.vector_store %arg9[%c0_10, %c128], %24 {strides = array<i32>} : memref<128x256xbf16, #tpu.memory_space<vmem>>, vector<128x32xbf16>,
    %cst_11 = arith.constant 0.000000e+00 : bf16
    %26 = vector.broadcast %cst_11 : bf16 to vector<128x96xbf16>
    %c0_12 = arith.constant 0 : index
    %c160 = arith.constant 160 : index
    %27 = vector.load %arg9[%c0_12, %c160] : memref<128x256xbf16, #tpu.memory_space<vmem>>, vector<128x96xbf16>
    tpu.vector_store %arg9[%c0_12, %c160], %26 {strides = array<i32>} : memref<128x256xbf16, #tpu.memory_space<vmem>>, vector<128x96xbf16>,
    %c0_13 = arith.constant 0 : index
    %c0_14 = arith.constant 0 : index
    %28 = vector.load %arg9[%c0_13, %c0_14] : memref<128x256xbf16, #tpu.memory_space<vmem>>, vector<128x256xbf16>
    %c0_15 = arith.constant 0 : index
    %c0_16 = arith.constant 0 : index
    %29 = vector.load %arg3[%c0_15, %c0_16] : memref<256x128xbf16, #tpu.memory_space<vmem>>, vector<256x128xbf16>
    %cst_17 = arith.constant dense<0.000000e+00> : vector<128x128xf32>
    %30 = tpu.matmul %28, %29, %cst_17 {dimension_numbers = #tpu.dot_dimension_numbers<[1], [0], [0], [1], [0, 0, 1, 1], [], []>} : vector<128x256xbf16>, vector<256x128xbf16>, vector<128x128xf32> -> vector<128x128xf32>
    %31 = vector.shape_cast %30 : vector<128x128xf32> to vector<8x16x128xf32>
    %c0_18 = arith.constant 0 : index
    %c0_19 = arith.constant 0 : index
    %32 = vector.load %arg4[%c0_18, %c0_19] : memref<1x128xf32, #tpu.memory_space<vmem>>, vector<1x128xf32>
    %33 = vector.shape_cast %32 : vector<1x128xf32> to vector<1x1x128xf32>
    %34 = vector.broadcast %33 : vector<1x1x128xf32> to vector<8x16x128xf32>
    %35 = arith.addf %31, %34 : vector<8x16x128xf32>
    %cst_20 = arith.constant 0.000000e+00 : f32
    %36 = vector.broadcast %cst_20 : f32 to vector<8x16x128xf32>
    %37 = arith.maximumf %35, %36 : vector<8x16x128xf32>
    %c0_21 = arith.constant 0 : index
    %c0_22 = arith.constant 0 : index
    %38 = vector.load %arg5[%c0_21, %c0_22] : memref<16x128xbf16, #tpu.memory_space<vmem>>, vector<16x128xbf16>
    %39 = arith.extf %38 : vector<16x128xbf16> to vector<16x128xf32>
    %40 = vector.shape_cast %39 : vector<16x128xf32> to vector<1x16x128xf32>
    %41 = vector.broadcast %40 : vector<1x16x128xf32> to vector<8x16x128xf32>
    %42 = arith.mulf %37, %41 : vector<8x16x128xf32>
    %cst_23 = arith.constant dense<0xFF800000> : vector<8x128xf32>
    %43 = vector.multi_reduction <maximumf>, %42, %cst_23 [1] : vector<8x16x128xf32> to vector<8x128xf32>
    %44 = arith.truncf %43 : vector<8x128xf32> to vector<8x128xbf16>
    %c0_24 = arith.constant 0 : index
    %c0_25 = arith.constant 0 : index
    %45 = vector.load %arg6[%c0_24, %c0_25] : memref<128x128xbf16, #tpu.memory_space<vmem>>, vector<128x128xbf16>
    %cst_26 = arith.constant dense<0.000000e+00> : vector<8x128xf32>
    %46 = tpu.matmul %44, %45, %cst_26 {dimension_numbers = #tpu.dot_dimension_numbers<[1], [0], [0], [1], [0, 0, 1, 1], [], []>} : vector<8x128xbf16>, vector<128x128xbf16>, vector<8x128xf32> -> vector<8x128xf32>
    %c0_27 = arith.constant 0 : index
    %c0_28 = arith.constant 0 : index
    %47 = vector.load %arg7[%c0_27, %c0_28] : memref<1x128xf32, #tpu.memory_space<vmem>>, vector<1x128xf32>
    %48 = vector.broadcast %47 : vector<1x128xf32> to vector<8x128xf32>
    %49 = arith.addf %46, %48 : vector<8x128xf32>
    %c0_29 = arith.constant 0 : index
    %c0_30 = arith.constant 0 : index
    %50 = vector.load %arg8[%c0_29, %c0_30] : memref<8x128xf32, #tpu.memory_space<vmem>>, vector<8x128xf32>
    tpu.vector_store %arg8[%c0_29, %c0_30], %49 {strides = array<i32>} : memref<8x128xf32, #tpu.memory_space<vmem>>, vector<8x128xf32>,
    return
  }
  func.func @transform_0(%arg0: i32) -> (i32, i32) {
    %c0_i32 = arith.constant 0 : i32
    %c0_i32_0 = arith.constant 0 : i32
    return %arg0, %c0_i32 : i32, i32
  }
  func.func @transform_1(%arg0: i32) -> (i32, i32) {
    %c0_i32 = arith.constant 0 : i32
    %c0_i32_0 = arith.constant 0 : i32
    %c0_i32_1 = arith.constant 0 : i32
    return %c0_i32, %c0_i32_0 : i32, i32
  }
  func.func @transform_2(%arg0: i32) -> (i32, i32) {
    %c0_i32 = arith.constant 0 : i32
    %c0_i32_0 = arith.constant 0 : i32
    %c0_i32_1 = arith.constant 0 : i32
    return %c0_i32, %c0_i32_0 : i32, i32
  }
  func.func @transform_3(%arg0: i32) -> (i32, i32) {
    %c0_i32 = arith.constant 0 : i32
    %c0_i32_0 = arith.constant 0 : i32
    %c0_i32_1 = arith.constant 0 : i32
    return %c0_i32, %c0_i32_0 : i32, i32
  }
  func.func @transform_4(%arg0: i32) -> (i32, i32) {
    %c0_i32 = arith.constant 0 : i32
    %c0_i32_0 = arith.constant 0 : i32
    %c0_i32_1 = arith.constant 0 : i32
    return %c0_i32, %c0_i32_0 : i32, i32
  }
  func.func @transform_5(%arg0: i32) -> (i32, i32) {
    %c0_i32 = arith.constant 0 : i32
    %c0_i32_0 = arith.constant 0 : i32
    %c0_i32_1 = arith.constant 0 : i32
    return %c0_i32, %c0_i32_0 : i32, i32
  }
  func.func @transform_6(%arg0: i32) -> (i32, i32) {
    %c0_i32 = arith.constant 0 : i32
    %c0_i32_0 = arith.constant 0 : i32
    %c0_i32_1 = arith.constant 0 : i32
    return %c0_i32, %c0_i32_0 : i32, i32
  }
  func.func @transform_7(%arg0: i32) -> (i32, i32) {
    %c0_i32 = arith.constant 0 : i32
    %c0_i32_0 = arith.constant 0 : i32
    return %arg0, %c0_i32 : i32, i32
  }
}

</mosaic_0001>

<bundles_post_ra>
// kernel: tpu_custom_call.1
= control target key start
LH: loop header
LB: loop body
LE: loop exit
PB: predicated region body
PF: predicated region fallthrough
CT: control target
= control target key end

     0   :  { %12 = vsyncpa [#allocation4], 0  ;;  %s2780_s0 = inlined_call_operand.vmem [shape: s32[8,16], index: 0, kind: input, shape index: {}]   ;;  %s2781_s1 = inlined_call_operand.vmem [shape: bf16[128,32], index: 1, kind: input, shape index: {}]   ;;  %s2782_s2 = inlined_call_operand.hbm [shape: bf16[256,128], index: 2, kind: input, shape index: {}]   ;;  %s2783_s3 = inlined_call_operand.vmem [shape: f32[1,128], index: 3, kind: input, shape index: {}]   ;;  %s2784_s4 = inlined_call_operand.vmem [shape: bf16[16,128], index: 4, kind: input, shape index: {}]   ;;  %s2785_s5 = inlined_call_operand.vmem [shape: bf16[128,128], index: 5, kind: input, shape index: {}]   ;;  %s2786_s6 = inlined_call_operand.vmem [shape: f32[1,128], index: 6, kind: input, shape index: {}]   ;;  %s2787_s7 = inlined_call_operand.hbm [shape: f32[8,128], index: 7, kind: output, shape index: {}]  }
   0x1   :  { %13 = vsyncpa [#allocation5], 0  ;;  %s2066_s24 = smov [#allocation3]  }
   0x2   :  { %s23_s25 = sshll.u32 %s2066_s24, 4  ;;  %s24_s25 = int_to_ptr.vmem [resolvable:$true] %s23_s25 }
   0x3   :  { %s2030_s26 = scalar_lea.vmem %s24_s25, 2048  ;;  %p2035_p1 = scmp.lt.s32.totalorder %s24_s25, %s24_s25 }
   0x4   :  { %p2031_p0 = scmp.ne.s32.totalorder %s24_s25, %s2030_s26  ;;  %p2036_p2 = scmp.lt.s32.totalorder %s2030_s26, %s2030_s26 }
   0x6   :  { %p2037_p3 = por %p2036_p2, %p2035_p1 }
   0x8   :  { %p2038_p4 = pnand %p2037_p3, %p2031_p0 }
   0xa   :  { %2041 = shalt.err (!%p2038_p4)
}
   0xb   :  { %s2067_s27 = smov 64   ;;  %s2068_s28 = smov 4  }
   0xc   :  { %29 = dma.hbm_to_vmem [thread:$0]  %s2782_s2, 2048, %s24_s25, [#allocation4], %s2067_s27, %s2067_s27, %s2068_s28  }
   0xd   :  { %2062 = dma.done.wait [#allocation4], 2048  }
   0xe   :  { %2063 = vsyncadd [#allocation4], 4294965248  ;;  %v43_v0 = vlaneseq  ;;  %v42_v4 = vld [vmem:[%s2780_s0] sm:$0xff]  ;;  %v1969_v7 = vld [vmem:[%s2781_s1 + $0x38] sm:$0xff]   ;;  %v2069_v32 = vmov 1.0|1.0  }
   0xf   :  { %v1970_v8 = vld [vmem:[%s2781_s1 + $0x30] sm:$0xff]   ;;  %1907 = vmatprep.subr.bf16.mxu0 %v1969_v7  ;;  %v1971_v13 = vld [vmem:[%s2781_s1 + $0x28] sm:$0xff]   ;;  %v1972_v17 = vld [vmem:[%s2781_s1 + $0x20] sm:$0xff]   ;;  %s2072_s24 = smov 96   ;;  %s2075_s19 = smov [#allocation6]  }
  0x10   :  { %v2121_v1 = vshrl.u32 %v43_v0, 7  ;;  %1908 = vmatpush3.bf16.msra.mxu0 %v1969_v7  ;;  %v1973_v19 = vld [vmem:[%s2781_s1 + $0x18] sm:$0xff]   ;;  %v1974_v21 = vld [vmem:[%s2781_s1 + $0x10] sm:$0xff]   ;;  %v1975_v23 = vld [vmem:[%s2781_s1 + $0x8] sm:$0xff]   ;;  %v44_v29 = vand.u32 127, %v43_v0  ;;  %s1579_s20 = sshll.u32 %s2075_s19, 4  ;;  %s1580_s20 = int_to_ptr.vmem [resolvable:$true] %s1579_s20 }
  0x11   :  { %1909 = vmatprep.subr.bf16.mxu0 %v1970_v8  ;;  %v1976_v25 = vld [vmem:[%s2781_s1] sm:$0xff]   ;;  %v1977_v45 = vld [vmem:[#allocation3 + $0x78] sm:$0xff]   ;;  %v1979_v49 = vld [vmem:[#allocation3 + $0x70] sm:$0xff]   ;;  %s2071_s1 = smov 32   ;;  %s2042_s21 = scalar_lea.vmem %s1580_s20, 128 }
  0x12   :  { %v58_v2 = vsub.s32 1, %v2121_v1  ;;  %v47_v3 = vsub.s32 0, %v2121_v1  ;;  %v69_v9 = vsub.s32 2, %v2121_v1  ;;  %v80_v10 = vsub.s32 3, %v2121_v1  ;;  %1834 = vmatprep.subr.bf16.mxu1 %v1977_v45  ;;  %v1978_v46 = vld [vmem:[#allocation3 + $0x38] sm:$0xff]   ;;  %v1980_v52 = vld [vmem:[#allocation3 + $0x30] sm:$0xff]   ;;  %p2043_p5 = scmp.ne.s32.totalorder %s1580_s20, %s2042_s21  ;;  %p2047_p6 = scmp.lt.s32.totalorder %s1580_s20, %s1580_s20 }
  0x13   :  { %v91_v11 = vsub.s32 4, %v2121_v1  ;;  %v102_v12 = vsub.s32 5, %v2121_v1  ;;  %v113_v15 = vsub.s32 6, %v2121_v1  ;;  %v124_v16 = vsub.s32 7, %v2121_v1  ;;  %1835 = vmatpush3.bf16.msra.mxu1 %v1978_v46  ;;  %v1981_v61 = vld [vmem:[#allocation3 + $0x68] sm:$0xff]   ;;  %p2048_p7 = scmp.lt.s32.totalorder %s2042_s21, %s2042_s21 }
  0x14   :  { %v59_v5 = vrot.slane %v42_v4, %v58_v2  ;;  %v48_v6 = vrot.slane %v42_v4, %v47_v3  ;;  %v70_v14 = vrot.slane %v42_v4, %v69_v9  ;;  %1910 = vmatpush3.bf16.msra.mxu0 %v1970_v8  ;;  %v81_v18 = vrot.slane %v42_v4, %v80_v10  ;;  %v1982_v3 = vld [vmem:[#allocation3 + $0x28] sm:$0xff]  }
  0x15   :  { %1911 = vmatprep.subr.bf16.mxu0 %v1971_v13  ;;  %v92_v20 = vrot.slane %v42_v4, %v91_v11  ;;  %v103_v22 = vrot.slane %v42_v4, %v102_v12  ;;  %v114_v24 = vrot.slane %v42_v4, %v113_v15  ;;  %v125_v26 = vrot.slane %v42_v4, %v124_v16  ;;  %p2049_p8 = por %p2048_p7, %p2047_p6 }
  0x16   :  { %61 = vbcast.lane.b32.xlu1 %v59_v5, 256  ;;  %50 = vbcast.lane.b32.xlu0 %v48_v6, 256 }
  0x17   :  { %1836 = vmatprep.subr.bf16.mxu1 %v1979_v49  ;;  %p2050_p9 = pnand %p2049_p8, %p2043_p5 }
  0x18   :  { %1912 = vmatpush3.bf16.msra.mxu0 %v1971_v13  ;;  %1837 = vmatpush3.bf16.msra.mxu1 %v1980_v52 }
  0x19   :  { %1913 = vmatprep.subr.bf16.mxu0 %v1972_v17  ;;  %1838 = vmatprep.subr.bf16.mxu1 %v1981_v61 }
  0x1a   :  { %65 = vbcast.lane.b32.xlu1 %v59_v5, 264  ;;  %54 = vbcast.lane.b32.xlu0 %v48_v6, 264 }
  0x1c   :  { %1914 = vmatpush3.bf16.msra.mxu0 %v1972_v17  ;;  %1839 = vmatpush3.bf16.msra.mxu1 %v1982_v3  ;;  %v1983_v17 = vld [vmem:[#allocation3 + $0x60] sm:$0xff]  }
  0x1d   :  { %1915 = vmatprep.subr.bf16.mxu0 %v1973_v19  ;;  %1840 = vmatprep.subr.bf16.mxu1 %v1983_v17  ;;  %v1989_v17 = vld [vmem:[#allocation3 + $0x48] sm:$0xff]  }
  0x1e   :  { %76 = vbcast.lane.b32.xlu1 %v70_v14, 264  ;;  %72 = vbcast.lane.b32.xlu0 %v70_v14, 256 }
  0x20   :  { %1916 = vmatpush3.bf16.msra.mxu0 %v1973_v19 }
  0x21   :  { %1917 = vmatprep.subr.bf16.mxu0 %v1974_v21 }
  0x22   :  { %87 = vbcast.lane.b32.xlu1 %v81_v18, 264  ;;  %83 = vbcast.lane.b32.xlu0 %v81_v18, 256  ;;  %v2070_v18 = vmov 0  }
  0x24   :  { %1918 = vmatpush3.bf16.msra.mxu0 %v1974_v21 }
  0x25   :  { %1919 = vmatprep.subr.bf16.mxu0 %v1975_v23 }
  0x26   :  { %98 = vbcast.lane.b32.xlu1 %v92_v20, 264  ;;  %94 = vbcast.lane.b32.xlu0 %v92_v20, 256 }
  0x28   :  { %1920 = vmatpush3.bf16.msra.mxu0 %v1975_v23  ;;  %v1984_v23 = vld [vmem:[#allocation3 + $0x20] sm:$0xff]  }
  0x29   :  { %1921 = vmatprep.subr.bf16.mxu0 %v1976_v25  ;;  %1841 = vmatpush3.bf16.msra.mxu1 %v1984_v23 }
  0x2a   :  { %109 = vbcast.lane.b32.xlu1 %v103_v22, 264  ;;  %105 = vbcast.lane.b32.xlu0 %v103_v22, 256 }
  0x2c   :  { %1922 = vmatpush3.bf16.msra.mxu0 %v1976_v25 }
  0x2e   :  { %120 = vbcast.lane.b32.xlu1 %v114_v24, 264  ;;  %116 = vbcast.lane.b32.xlu0 %v114_v24, 256 }
  0x32   :  { %131 = vbcast.lane.b32.xlu1 %v125_v26, 264  ;;  %127 = vbcast.lane.b32.xlu0 %v125_v26, 256 }
  0x88   :  { %v62_v27 = vpop.permute.xlu1 %61  ;;  %v51_v28 = vpop.permute.xlu0 %50 }
  0x89   :  { %vm135_vm0 = vcmp.eq.s32.totalorder %v62_v27, %v44_v29  ;;  %vm133_vm3 = vcmp.eq.s32.totalorder %v51_v28, %v44_v29 }
  0x8c   :  { %v66_v30 = vpop.permute.xlu1 %65  ;;  %v55_v31 = vpop.permute.xlu0 %54 }
  0x8d   :  { %vm136_vm1 = vcmp.eq.s32.totalorder %v66_v30, %v44_v29  ;;  %vm134_vm2 = vcmp.eq.s32.totalorder %v55_v31, %v44_v29 }
  0x8e   :  { %vm1598_vm4 = vmpackc.low %vm136_vm1, %vm135_vm0 }
  0x8f   :  { %vm1596_vm5 = vmpackc.low %vm134_vm2, %vm133_vm3 }
  0x90   :  { %1923 = vmatprep.mubr.msk.bf16.mxu0 %vm1596_vm5, %v2069_v32  ;;  %v77_v33 = vpop.permute.xlu1 %76  ;;  %v73_v34 = vpop.permute.xlu0 %72 }
  0x91   :  { %1924 = vmatmul.mubr.msk.bf16.vlgmr.msra.gmra.mxu0 %vm1598_vm4, %v2069_v32  ;;  %vm138_vm6 = vcmp.eq.s32.totalorder %v77_v33, %v44_v29  ;;  %vm137_vm7 = vcmp.eq.s32.totalorder %v73_v34, %v44_v29 }
  0x92   :  { %vm1600_vm8 = vmpackc.low %vm138_vm6, %vm137_vm7 }
  0x93   :  { %1927 = vmatprep.mubr.msk.bf16.mxu0 %vm1600_vm8, %v2069_v32  ;;  %vm398_vm8 = vcmask 257024  }
  0x94   :  { %v88_v35 = vpop.permute.xlu1 %87  ;;  %v84_v36 = vpop.permute.xlu0 %83 }
  0x95   :  { %vm140_vm9 = vcmp.eq.s32.totalorder %v88_v35, %v44_v29  ;;  %vm139_vm10 = vcmp.eq.s32.totalorder %v84_v36, %v44_v29  ;;  %v1985_v35 = vld [vmem:[#allocation3 + $0x58] sm:$0xff]  }
  0x96   :  { %vm1602_vm11 = vmpackc.low %vm140_vm9, %vm139_vm10  ;;  %vm871_vm9 = vcmp.lt.s32.totalorder %v2121_v1, 4  ;;  %vm433_vm10 = vcmp.lt.s32.totalorder %v2121_v1, 7  ;;  %1842 = vmatprep.subr.bf16.mxu1 %v1985_v35 }
  0x98   :  { %v99_v37 = vpop.permute.xlu1 %98  ;;  %v95_v38 = vpop.permute.xlu0 %94 }
  0x99   :  { %1928 = vmatmul.mubr.msk.bf16.gmra.mxu0 %vm1602_vm11, %v2069_v32  ;;  %vm142_vm12 = vcmp.eq.s32.totalorder %v99_v37, %v44_v29  ;;  %vm141_vm13 = vcmp.eq.s32.totalorder %v95_v38, %v44_v29  ;;  %vm579_vm11 = vcmp.lt.s32.totalorder %v2121_v1, 6 }
  0x9a   :  { %vm1604_vm14 = vmpackc.low %vm142_vm12, %vm141_vm13  ;;  %vm968_vm12 = vcmask 1043712   ;;  %vm725_vm13 = vcmp.lt.s32.totalorder %v2121_v1, 5 }
  0x9b   :  { %1931 = vmatprep.mubr.msk.bf16.mxu0 %vm1604_vm14, %v2069_v32  ;;  %vm546_vm14 = vcmask 519424  }
  0x9c   :  { %v110_v39 = vpop.permute.xlu1 %109  ;;  %v106_v40 = vpop.permute.xlu0 %105 }
  0x9d   :  { %vm144_vm15 = vcmp.eq.s32.totalorder %v110_v39, %v44_v29  ;;  %vm143_vm0 = vcmp.eq.s32.totalorder %v106_v40, %v44_v29  ;;  %v1986_v40 = vld [vmem:[#allocation3 + $0x18] sm:$0xff]  }
  0x9e   :  { %vm1606_vm1 = vmpackc.low %vm144_vm15, %vm143_vm0  ;;  %1843 = vmatpush3.bf16.msra.mxu1 %v1986_v40  ;;  %vm692_vm15 = vcmask 781824   ;;  %vm838_vm0 = vcmask 1044224  }
  0xa0   :  { %v121_v41 = vpop.permute.xlu1 %120  ;;  %v117_v42 = vpop.permute.xlu0 %116 }
  0xa1   :  { %1932 = vmatmul.mubr.msk.bf16.gmra.mxu0 %vm1606_vm1, %v2069_v32  ;;  %vm146_vm2 = vcmp.eq.s32.totalorder %v121_v41, %v44_v29  ;;  %vm145_vm3 = vcmp.eq.s32.totalorder %v117_v42, %v44_v29  ;;  %vm2074_vm1 = vmmov 0  }
  0xa2   :  { %vm1608_vm4 = vmpackc.low %vm146_vm2, %vm145_vm3  ;;  %vm1468_vm2 = vcmask 1041409   ;;  %vm1470_vm3 = vcmask 1042434  }
  0xa3   :  { %1935 = vmatprep.mubr.msk.bf16.mxu0 %vm1608_vm4, %v2069_v32  ;;  %vm1472_vm4 = vcmask 1043459  }
  0xa4   :  { %v132_v43 = vpop.permute.xlu1 %131  ;;  %v128_v44 = vpop.permute.xlu0 %127 }
  0xa5   :  { %vm148_vm5 = vcmp.eq.s32.totalorder %v132_v43, %v44_v29  ;;  %vm147_vm6 = vcmp.eq.s32.totalorder %v128_v44, %v44_v29 }
  0xa6   :  { %vm1610_vm7 = vmpackc.low %vm148_vm5, %vm147_vm6  ;;  %vm1474_vm5 = vcmask 1044484   ;;  %vm1476_vm6 = vcmask 1045509  }
  0xa9   :  { %1936 = vmatmul.mubr.msk.bf16.gmra.mxu0 %vm1610_vm7, %v2069_v32  ;;  %vm1478_vm7 = vcmask 1046534  }
 0x151   :  { %v2158_v47 = vpop.f32.mrf.mxu0 }
 0x152   :  { %v1736_v48 = vpack.c.bf16 %v2158_v47, %v2158_v47  ;;  %v857_v54 = vrot.slane %v2158_v47, 4  ;;  %v417_v58 = vrot.slane %v2158_v47, 1  ;;  %v565_v2 = vrot.slane %v2158_v47, 2 }
 0x153   :  { %v2162_v50 = vpop.f32.mrf.mxu0  ;;  %v711_v27 = vrot.slane %v2158_v47, 3 }
 0x154   :  { %v1734_v51 = vpack.c.bf16 %v2162_v50, %v2162_v50  ;;  %401 = vst.msk [vmem:[#allocation2 + $0x10] sm:$0xf] %vm398_vm8, %v1736_v48  ;;  %v855_v4 = vrot.slane %v2162_v50, 4  ;;  %v415_v45 = vrot.slane %v2162_v50, 1  ;;  %v709_v23 = vrot.slane %v2162_v50, 3 }
 0x155   :  { %v2167_v53 = vpop.f32.mrf.mxu0 }
 0x156   :  { %v1737_v55 = vpack.c.bf16 %v2167_v53, %v2167_v53  ;;  %v418_v56 = vrot.slane %v2167_v53, 1  ;;  %v858_v57 = vrot.slane %v2167_v53, 4  ;;  %399 = vst.msk [vmem:[#allocation2] sm:$0xf] %vm398_vm8, %v1734_v51  ;;  %v566_v60 = vrot.slane %v2167_v53, 2 }
 0x157   :  { %v2179_v59 = vpop.f32.mrf.mxu0  ;;  %v712_v9 = vrot.slane %v2167_v53, 3 }
 0x158   :  { %v884_v62 = vsel %vm871_vm9, %v857_v54, %v858_v57  ;;  %402 = vst.msk [vmem:[#allocation2 + $0x18] sm:$0xf] %vm398_vm8, %v1737_v55  ;;  %v1735_v63 = vpack.c.bf16 %v2179_v59, %v2179_v59  ;;  %v416_v0 = vrot.slane %v2179_v59, 1  ;;  %v856_v6 = vrot.slane %v2179_v59, 4 }
 0x159   :  { %v1800_v5 = vpack.c.bf16 %v884_v62, %v884_v62  ;;  %v2191_v7 = vpop.f32.mrf.mxu0  ;;  %v446_v8 = vsel %vm433_vm10, %v417_v58, %v418_v56  ;;  %v592_v11 = vsel %vm579_vm11, %v565_v2, %v566_v60  ;;  %v710_v30 = vrot.slane %v2179_v59, 3 }
 0x15a   :  { %400 = vst.msk [vmem:[#allocation2 + $0x8] sm:$0xf] %vm398_vm8, %v1735_v63  ;;  %v1740_v10 = vpack.c.bf16 %v2191_v7, %v2191_v7  ;;  %v885_v12 = vsel %vm871_vm9, %v856_v6, %v857_v54  ;;  %v886_v13 = vsel %vm871_vm9, %v855_v4, %v856_v6  ;;  %v1752_v14 = vpack.c.bf16 %v446_v8, %v446_v8 }
 0x15b   :  { %954 = vst.msk [vmem:[#allocation2 + $0x14] sm:$0xf] %vm398_vm8, %v1800_v5  ;;  %v2212_v15 = vpop.f32.mrf.mxu0  ;;  %v447_v16 = vsel %vm433_vm10, %v416_v0, %v417_v58  ;;  %v1798_v19 = vpack.c.bf16 %v886_v13, %v886_v13  ;;  %v1799_v20 = vpack.c.bf16 %v885_v12, %v885_v12  ;;  %v861_v21 = vrot.slane %v2191_v7, 4 }
 0x15c   :  { %971 = vst.msk [vmem:[#allocation2 + $0x14] sm:$0xf] %vm968_vm12, %v2070_v18  ;;  %v1738_v22 = vpack.c.bf16 %v2212_v15, %v2212_v15  ;;  %502 = vrot.lane.b32.xlu0 %v1752_v14, %s2071_s1  ;;  %v859_v24 = vrot.slane %v2212_v15, 4  ;;  %v1751_v25 = vpack.c.bf16 %v447_v16, %v447_v16  ;;  %v1768_v32 = vpack.c.bf16 %v592_v11, %v592_v11 }
 0x15d   :  { %405 = vst.msk [vmem:[#allocation2 + $0x30] sm:$0xf] %vm398_vm8, %v1740_v10  ;;  %v2226_v26 = vpop.f32.mrf.mxu0  ;;  %952 = vst.msk [vmem:[#allocation2 + $0x4] sm:$0xf] %vm398_vm8, %v1798_v19  ;;  %v564_v34 = vrot.slane %v2179_v59, 2  ;;  %v738_v39 = vsel %vm725_vm13, %v711_v27, %v712_v9  ;;  %v419_v46 = vrot.slane %v2212_v15, 1  ;;  %v739_v55 = vsel %vm725_vm13, %v710_v30, %v711_v27 }
 0x15e   :  { %953 = vst.msk [vmem:[#allocation2 + $0xc] sm:$0xf] %vm398_vm8, %v1799_v20  ;;  %403 = vst.msk [vmem:[#allocation2 + $0x20] sm:$0xf] %vm398_vm8, %v1738_v22  ;;  %v1741_v28 = vpack.c.bf16 %v2226_v26, %v2226_v26  ;;  %v862_v29 = vrot.slane %v2226_v26, 4  ;;  %v883_v31 = vsel %vm871_vm9, %v858_v57, %v859_v24  ;;  %500 = vrot.lane.b32.xlu1 %v1751_v25, %s2071_s1  ;;  %v1987_v57 = vld [vmem:[#allocation3 + $0x50] sm:$0xff]  }
 0x15f   :  { %969 = vst.msk [vmem:[#allocation2 + $0x4] sm:$0xf] %vm968_vm12, %v2070_v18  ;;  %970 = vst.msk [vmem:[#allocation2 + $0xc] sm:$0xf] %vm968_vm12, %v2070_v18  ;;  %v2244_v33 = vpop.f32.mrf.mxu0  ;;  %v1801_v36 = vpack.c.bf16 %v883_v31, %v883_v31  ;;  %v593_v43 = vsel %vm579_vm11, %v564_v34, %v565_v2  ;;  %v1784_v52 = vpack.c.bf16 %v738_v39, %v738_v39  ;;  %v1988_v2 = vld [vmem:[#allocation3 + $0x10] sm:$0xff]   ;;  %1844 = vmatprep.subr.bf16.mxu1 %v1987_v57  ;;  %v1990_v22 = vld [vmem:[#allocation3 + $0x8] sm:$0xff]  }
 0x160   :  { %v880_v37 = vsel %vm871_vm9, %v861_v21, %v862_v29  ;;  %406 = vst.msk [vmem:[#allocation2 + $0x38] sm:$0xf] %vm398_vm8, %v1741_v28  ;;  %v1739_v38 = vpack.c.bf16 %v2244_v33, %v2244_v33  ;;  %648 = vrot.lane.b32.xlu0 %v1768_v32, %s2067_s27  ;;  %v860_v42 = vrot.slane %v2244_v33, 4  ;;  %v1767_v47 = vpack.c.bf16 %v593_v43, %v593_v43  ;;  %v1991_v39 = vld [vmem:[#allocation3 + $0x40] sm:$0xff]  }
 0x161   :  { %v1804_v41 = vpack.c.bf16 %v880_v37, %v880_v37  ;;  %v2264_v44 = vpop.f32.mrf.mxu0  ;;  %955 = vst.msk [vmem:[#allocation2 + $0x1c] sm:$0xf] %vm398_vm8, %v1801_v36  ;;  %v448_v6 = vsel %vm433_vm10, %v415_v45, %v416_v0  ;;  %v1783_v8 = vpack.c.bf16 %v739_v55, %v739_v55  ;;  %v563_v12 = vrot.slane %v2162_v50, 2  ;;  %1845 = vmatpush3.bf16.msra.mxu1 %v1988_v2 }
 0x162   :  { %404 = vst.msk [vmem:[#allocation2 + $0x28] sm:$0xf] %vm398_vm8, %v1739_v38  ;;  %v1744_v48 = vpack.c.bf16 %v2264_v44, %v2264_v44  ;;  %v881_v49 = vsel %vm871_vm9, %v860_v42, %v861_v21  ;;  %v882_v51 = vsel %vm871_vm9, %v859_v24, %v860_v42  ;;  %646 = vrot.lane.b32.xlu1 %v1767_v47, %s2067_s27  ;;  %v865_v62 = vrot.slane %v2264_v44, 4  ;;  %v1992_v47 = vld [vmem:[#allocation3] sm:$0xff]  }
 0x163   :  { %972 = vst.msk [vmem:[#allocation2 + $0x1c] sm:$0xf] %vm968_vm12, %v2070_v18  ;;  %v2279_v54 = vpop.f32.mrf.mxu0  ;;  %v1802_v58 = vpack.c.bf16 %v882_v51, %v882_v51  ;;  %v1803_v61 = vpack.c.bf16 %v881_v49, %v881_v49  ;;  %v1750_v13 = vpack.c.bf16 %v448_v6, %v448_v6  ;;  %v445_v16 = vsel %vm433_vm10, %v418_v56, %v419_v46 }
 0x164   :  { %958 = vst.msk [vmem:[#allocation2 + $0x34] sm:$0xf] %vm398_vm8, %v1804_v41  ;;  %409 = vst.msk [vmem:[#allocation2 + $0x50] sm:$0xf] %vm398_vm8, %v1744_v48  ;;  %v1742_v63 = vpack.c.bf16 %v2279_v54, %v2279_v54  ;;  %794 = vrot.lane.b32.xlu0 %v1784_v52, %s2072_s24  ;;  %v863_v3 = vrot.slane %v2279_v54, 4  ;;  %v594_v56 = vsel %vm579_vm11, %v563_v12, %v564_v34  ;;  %1846 = vmatprep.subr.bf16.mxu1 %v1989_v17 }
 0x165   :  { %975 = vst.msk [vmem:[#allocation2 + $0x34] sm:$0xf] %vm968_vm12, %v2070_v18  ;;  %v2294_v5 = vpop.f32.mrf.mxu0  ;;  %v421_v28 = vrot.slane %v2191_v7, 1  ;;  %v1753_v31 = vpack.c.bf16 %v445_v16, %v445_v16  ;;  %1847 = vmatpush3.bf16.msra.mxu1 %v1990_v22  ;;  %v1766_v36 = vpack.c.bf16 %v594_v56, %v594_v56  ;;  %v567_v38 = vrot.slane %v2212_v15, 2 }
 0x166   :  { %956 = vst.msk [vmem:[#allocation2 + $0x24] sm:$0xf] %vm398_vm8, %v1802_v58  ;;  %957 = vst.msk [vmem:[#allocation2 + $0x2c] sm:$0xf] %vm398_vm8, %v1803_v61  ;;  %v1745_v10 = vpack.c.bf16 %v2294_v5, %v2294_v5  ;;  %v866_v11 = vrot.slane %v2294_v5, 4  ;;  %v879_v0 = vsel %vm871_vm9, %v862_v29, %v863_v3  ;;  %792 = vrot.lane.b32.xlu1 %v1783_v8, %s2072_s24  ;;  %v713_v29 = vrot.slane %v2212_v15, 3 }
 0x167   :  { %407 = vst.msk [vmem:[#allocation2 + $0x40] sm:$0xf] %vm398_vm8, %v1742_v63  ;;  %v2317_v14 = vpop.f32.mrf.mxu0  ;;  %v1805_v19 = vpack.c.bf16 %v879_v0, %v879_v0  ;;  %v422_v40 = vrot.slane %v2226_v26, 1  ;;  %v591_v51 = vsel %vm579_vm11, %v566_v60, %v567_v38  ;;  %v740_v55 = vsel %vm725_vm13, %v709_v23, %v710_v30  ;;  %1848 = vmatprep.subr.bf16.mxu1 %v1991_v39 }
 0x168   :  { %973 = vst.msk [vmem:[#allocation2 + $0x24] sm:$0xf] %vm968_vm12, %v2070_v18  ;;  %974 = vst.msk [vmem:[#allocation2 + $0x2c] sm:$0xf] %vm968_vm12, %v2070_v18  ;;  %v876_v20 = vsel %vm871_vm9, %v865_v62, %v866_v11  ;;  %v1743_v21 = vpack.c.bf16 %v2317_v14, %v2317_v14  ;;  %498 = vrot.lane.b32.xlu0 %v1750_v13, %s2071_s1  ;;  %v864_v25 = vrot.slane %v2317_v14, 4  ;;  %v420_v57 = vrot.slane %v2244_v33, 1 }
 0x169   :  { %410 = vst.msk [vmem:[#allocation2 + $0x58] sm:$0xf] %vm398_vm8, %v1745_v10  ;;  %v1808_v24 = vpack.c.bf16 %v876_v20, %v876_v20  ;;  %v2342_v27 = vpop.f32.mrf.mxu0  ;;  %959 = vst.msk [vmem:[#allocation2 + $0x3c] sm:$0xf] %vm398_vm8, %v1805_v19  ;;  %v1769_v58 = vpack.c.bf16 %v591_v51, %v591_v51  ;;  %1849 = vmatpush3.bf16.msra.mxu1 %v1992_v47  ;;  %v1782_v61 = vpack.c.bf16 %v740_v55, %v740_v55 }
 0x16a   :  { %408 = vst.msk [vmem:[#allocation2 + $0x48] sm:$0xf] %vm398_vm8, %v1743_v21  ;;  %v1748_v32 = vpack.c.bf16 %v2342_v27, %v2342_v27  ;;  %v877_v34 = vsel %vm871_vm9, %v864_v25, %v865_v62  ;;  %v878_v35 = vsel %vm871_vm9, %v863_v3, %v864_v25  ;;  %504 = vrot.lane.b32.xlu1 %v1753_v31, %s2071_s1  ;;  %v869_v48 = vrot.slane %v2342_v27, 4 }
 0x16b   :  { %976 = vst.msk [vmem:[#allocation2 + $0x3c] sm:$0xf] %vm968_vm12, %v2070_v18  ;;  %v2357_v37 = vpop.f32.mrf.mxu0  ;;  %v1806_v41 = vpack.c.bf16 %v878_v35, %v878_v35  ;;  %v1807_v42 = vpack.c.bf16 %v877_v34, %v877_v34  ;;  %v737_v62 = vsel %vm725_vm13, %v712_v9, %v713_v29  ;;  %v442_v2 = vsel %vm433_vm10, %v421_v28, %v422_v40 }
 0x16c   :  { %962 = vst.msk [vmem:[#allocation2 + $0x54] sm:$0xf] %vm398_vm8, %v1808_v24  ;;  %413 = vst.msk [vmem:[#allocation2 + $0x70] sm:$0xf] %vm398_vm8, %v1748_v32  ;;  %v1746_v43 = vpack.c.bf16 %v2357_v37, %v2357_v37  ;;  %644 = vrot.lane.b32.xlu0 %v1766_v36, %s2067_s27  ;;  %v867_v49 = vrot.slane %v2357_v37, 4  ;;  %v1785_v9 = vpack.c.bf16 %v737_v62, %v737_v62  ;;  %v569_v10 = vrot.slane %v2191_v7, 2 }
 0x16d   :  { %979 = vst.msk [vmem:[#allocation2 + $0x54] sm:$0xf] %vm968_vm12, %v2070_v18  ;;  %v2376_v52 = vpop.f32.mrf.mxu0  ;;  %v1756_v0 = vpack.c.bf16 %v442_v2, %v442_v2  ;;  %v443_v13 = vsel %vm433_vm10, %v420_v57, %v421_v28  ;;  %v715_v16 = vrot.slane %v2191_v7, 3  ;;  %v716_v17 = vrot.slane %v2226_v26, 3 }
 0x16e   :  { %960 = vst.msk [vmem:[#allocation2 + $0x44] sm:$0xf] %vm398_vm8, %v1806_v41  ;;  %961 = vst.msk [vmem:[#allocation2 + $0x4c] sm:$0xf] %vm398_vm8, %v1807_v42  ;;  %v1749_v60 = vpack.c.bf16 %v2376_v52, %v2376_v52  ;;  %v875_v59 = vsel %vm871_vm9, %v866_v11, %v867_v49  ;;  %v870_v30 = vrot.slane %v2376_v52, 4  ;;  %650 = vrot.lane.b32.xlu1 %v1769_v58, %s2067_s27  ;;  %v570_v11 = vrot.slane %v2226_v26, 2 }
 0x16f   :  { %411 = vst.msk [vmem:[#allocation2 + $0x60] sm:$0xf] %vm398_vm8, %v1746_v43  ;;  %v1809_v63 = vpack.c.bf16 %v875_v59, %v875_v59  ;;  %v1755_v7 = vpack.c.bf16 %v443_v13, %v443_v13  ;;  %v714_v20 = vrot.slane %v2244_v33, 3  ;;  %v2445_v22 = vpop.f32.mrf.mxu0  ;;  %v734_v24 = vsel %vm725_vm13, %v715_v16, %v716_v17 }
 0x170   :  { %977 = vst.msk [vmem:[#allocation2 + $0x44] sm:$0xf] %vm968_vm12, %v2070_v18  ;;  %978 = vst.msk [vmem:[#allocation2 + $0x4c] sm:$0xf] %vm968_vm12, %v2070_v18  ;;  %v872_v3 = vsel %vm871_vm9, %v869_v48, %v870_v30  ;;  %v887_v53 = vsel %vm871_vm9, %v870_v30, %v855_v4  ;;  %790 = vrot.lane.b32.xlu0 %v1782_v61, %s2072_s24  ;;  %v568_v4 = vrot.slane %v2244_v33, 2  ;;  %v423_v33 = vrot.slane %v2279_v54, 1 }
 0x171   :  { %414 = vst.msk [vmem:[#allocation2 + $0x78] sm:$0xf] %vm398_vm8, %v1749_v60  ;;  %963 = vst.msk [vmem:[#allocation2 + $0x5c] sm:$0xf] %vm398_vm8, %v1809_v63  ;;  %v1812_v6 = vpack.c.bf16 %v872_v3, %v872_v3  ;;  %v1813_v8 = vpack.c.bf16 %v887_v53, %v887_v53  ;;  %v588_v19 = vsel %vm579_vm11, %v569_v10, %v570_v11  ;;  %v868_v34 = vrot.slane %v2445_v22, 4 }
 0x172   :  { %980 = vst.msk [vmem:[#allocation2 + $0x5c] sm:$0xf] %vm968_vm12, %v2070_v18  ;;  %796 = vrot.lane.b32.xlu1 %v1785_v9, %s2072_s24  ;;  %v1772_v21 = vpack.c.bf16 %v588_v19, %v588_v19  ;;  %v589_v56 = vsel %vm579_vm11, %v568_v4, %v569_v10  ;;  %v1747_v28 = vpack.c.bf16 %v2445_v22, %v2445_v22  ;;  %v430_v36 = vrot.slane %v2376_v52, 1 }
 0x173   :  { %966 = vst.msk [vmem:[#allocation2 + $0x74] sm:$0xf] %vm398_vm8, %v1812_v6  ;;  %967 = vst.msk [vmem:[#allocation2 + $0x7c] sm:$0xf] %vm398_vm8, %v1813_v8  ;;  %v1771_v25 = vpack.c.bf16 %v589_v56, %v589_v56  ;;  %v1788_v31 = vpack.c.bf16 %v734_v24, %v734_v24  ;;  %v735_v32 = vsel %vm725_vm13, %v714_v20, %v715_v16  ;;  %v571_v55 = vrot.slane %v2279_v54, 2 }
 0x174   :  { %983 = vst.msk [vmem:[#allocation2 + $0x74] sm:$0xf] %vm968_vm12, %v2070_v18  ;;  %984 = vst.msk [vmem:[#allocation2 + $0x7c] sm:$0xf] %vm968_vm12, %v2070_v18  ;;  %510 = vrot.lane.b32.xlu0 %v1756_v0, %s2071_s1  ;;  %v444_v35 = vsel %vm433_vm10, %v419_v46, %v420_v57  ;;  %v873_v39 = vsel %vm871_vm9, %v868_v34, %v869_v48  ;;  %v874_v41 = vsel %vm871_vm9, %v867_v49, %v868_v34 }
 0x175   :  { %412 = vst.msk [vmem:[#allocation2 + $0x68] sm:$0xf] %vm398_vm8, %v1747_v28  ;;  %v1787_v42 = vpack.c.bf16 %v735_v32, %v735_v32  ;;  %v1810_v43 = vpack.c.bf16 %v874_v41, %v874_v41  ;;  %v1811_v47 = vpack.c.bf16 %v873_v39, %v873_v39  ;;  %v1754_v46 = vpack.c.bf16 %v444_v35, %v444_v35 }
 0x176   :  { %508 = vrot.lane.b32.xlu1 %v1755_v7, %s2071_s1  ;;  %v441_v51 = vsel %vm433_vm10, %v422_v40, %v423_v33  ;;  %v723_v48 = vrot.slane %v2342_v27, 3  ;;  %v590_v49 = vsel %vm579_vm11, %v567_v38, %v568_v4  ;;  %v722_v57 = vrot.slane %v2445_v22, 3 }
 0x177   :  { %964 = vst.msk [vmem:[#allocation2 + $0x64] sm:$0xf] %vm398_vm8, %v1810_v43  ;;  %965 = vst.msk [vmem:[#allocation2 + $0x6c] sm:$0xf] %vm398_vm8, %v1811_v47  ;;  %v425_v58 = vrot.slane %v2264_v44, 1  ;;  %v2503_v38 = vsel %vm433_vm10, %v430_v36, %v415_v45  ;;  %v717_v40 = vrot.slane %v2279_v54, 3  ;;  %v1757_v30 = vpack.c.bf16 %v441_v51, %v441_v51 }
 0x178   :  { %656 = vrot.lane.b32.xlu0 %v1772_v21, %s2067_s27  ;;  %981 = vst.msk [vmem:[#allocation2 + $0x64] sm:$0xf] %vm968_vm12, %v2070_v18  ;;  %982 = vst.msk [vmem:[#allocation2 + $0x6c] sm:$0xf] %vm968_vm12, %v2070_v18  ;;  %v426_v60 = vrot.slane %v2294_v5, 1  ;;  %v724_v59 = vrot.slane %v2376_v52, 3  ;;  %v1770_v61 = vpack.c.bf16 %v590_v49, %v590_v49  ;;  %v587_v18 = vsel %vm579_vm11, %v570_v11, %v571_v55 }
 0x179   :  { %v576_v62 = vrot.slane %v2445_v22, 2  ;;  %v577_v63 = vrot.slane %v2342_v27, 2  ;;  %v736_v45 = vsel %vm725_vm13, %v713_v29, %v714_v20  ;;  %v2523_v2 = vsel %vm725_vm13, %v722_v57, %v723_v48 }
 0x17a   :  { %654 = vrot.lane.b32.xlu1 %v1771_v25, %s2067_s27  ;;  %v578_v3 = vrot.slane %v2376_v52, 2  ;;  %v2528_v53 = vsel %vm725_vm13, %v723_v48, %v724_v59  ;;  %v1773_v29 = vpack.c.bf16 %v587_v18, %v587_v18  ;;  %v424_v8 = vrot.slane %v2317_v14, 1 }
 0x17b   :  { %v2535_v15 = vsel %vm579_vm11, %v576_v62, %v577_v63  ;;  %v1786_v10 = vpack.c.bf16 %v736_v45, %v736_v45  ;;  %v733_v11 = vsel %vm725_vm13, %v716_v17, %v717_v40  ;;  %v2558_v0 = vsel %vm725_vm13, %v724_v59, %v709_v23 }
 0x17c   :  { %802 = vrot.lane.b32.xlu0 %v1788_v31, %s2072_s24  ;;  %v2539_v9 = vsel %vm579_vm11, %v577_v63, %v578_v3  ;;  %v2545_v6 = vsel %vm579_vm11, %v578_v3, %v563_v12  ;;  %v438_v12 = vsel %vm433_vm10, %v425_v58, %v426_v60  ;;  %v573_v13 = vrot.slane %v2264_v44, 2 }
 0x17d   :  { %v574_v4 = vrot.slane %v2294_v5, 2  ;;  %v1789_v26 = vpack.c.bf16 %v733_v11, %v733_v11  ;;  %v1760_v16 = vpack.c.bf16 %v438_v12, %v438_v12  ;;  %v439_v50 = vsel %vm433_vm10, %v424_v8, %v425_v58 }
 0x17e   :  { %800 = vrot.lane.b32.xlu1 %v1787_v42, %s2072_s24  ;;  %v572_v17 = vrot.slane %v2317_v14, 2  ;;  %v719_v23 = vrot.slane %v2264_v44, 3  ;;  %v720_v19 = vrot.slane %v2294_v5, 3  ;;  %v1759_v20 = vpack.c.bf16 %v439_v50, %v439_v50  ;;  %v1995_v50 = vld [vmem:[#allocation2 + $0x4] ss:$8 sps:$4 sm:$0xff]  }
 0x17f   :  { %v584_v7 = vsel %vm579_vm11, %v573_v13, %v574_v4  ;;  %v718_v21 = vrot.slane %v2317_v14, 3  ;;  %v427_v25 = vrot.slane %v2357_v37, 1  ;;  %v440_v14 = vsel %vm433_vm10, %v423_v33, %v424_v8  ;;  %1241 = vmatprep.mubr.bf16.mxu1 %v1995_v50 }
 0x180   :  { %506 = vrot.lane.b32.xlu0 %v1754_v46, %s2071_s1  ;;  %v1776_v56 = vpack.c.bf16 %v584_v7, %v584_v7  ;;  %v585_v24 = vsel %vm579_vm11, %v572_v17, %v573_v13  ;;  %v730_v44 = vsel %vm725_vm13, %v719_v23, %v720_v19  ;;  %v1758_v34 = vpack.c.bf16 %v440_v14, %v440_v14 }
 0x181   :  { %v1775_v5 = vpack.c.bf16 %v585_v24, %v585_v24  ;;  %v1792_v28 = vpack.c.bf16 %v730_v44, %v730_v44  ;;  %v731_v31 = vsel %vm725_vm13, %v718_v21, %v719_v23  ;;  %v437_v35 = vsel %vm433_vm10, %v426_v60, %v427_v25  ;;  %v1996_v23 = vld [vmem:[#allocation2 + $0x14] ss:$8 sps:$4 sm:$0xff]  }
 0x182   :  { %512 = vrot.lane.b32.xlu1 %v1757_v30, %s2071_s1  ;;  %v1791_v32 = vpack.c.bf16 %v731_v31, %v731_v31  ;;  %v575_v39 = vrot.slane %v2357_v37, 2  ;;  %v586_v41 = vsel %vm579_vm11, %v571_v55, %v572_v17  ;;  %v1761_v42 = vpack.c.bf16 %v437_v35, %v437_v35  ;;  %v1998_v35 = vld [vmem:[#allocation2 + $0x24] ss:$8 sps:$4 sm:$0xff]  }
 0x183   :  { %v721_v33 = vrot.slane %v2357_v37, 3  ;;  %v1774_v43 = vpack.c.bf16 %v586_v41, %v586_v41  ;;  %v429_v46 = vrot.slane %v2342_v27, 1  ;;  %v732_v51 = vsel %vm725_vm13, %v717_v40, %v718_v21 }
 0x184   :  { %652 = vrot.lane.b32.xlu0 %v1770_v61, %s2067_s27  ;;  %v583_v47 = vsel %vm579_vm11, %v574_v4, %v575_v39  ;;  %v1790_v48 = vpack.c.bf16 %v732_v51, %v732_v51  ;;  %v428_v49 = vrot.slane %v2445_v22, 1  ;;  %v1765_v60 = vpack.c.bf16 %v2503_v38, %v2503_v38 }
 0x185   :  { %v1777_v55 = vpack.c.bf16 %v583_v47, %v583_v47  ;;  %v729_v37 = vsel %vm725_vm13, %v720_v19, %v721_v33  ;;  %v434_v27 = vsel %vm433_vm10, %v429_v46, %v430_v36  ;;  %v582_v36 = vsel %vm579_vm11, %v575_v39, %v576_v62 }
 0x186   :  { %658 = vrot.lane.b32.xlu1 %v1773_v29, %s2067_s27  ;;  %v1793_v54 = vpack.c.bf16 %v729_v37, %v729_v37  ;;  %v1764_v58 = vpack.c.bf16 %v434_v27, %v434_v27  ;;  %v436_v40 = vsel %vm433_vm10, %v427_v25, %v428_v49  ;;  %v435_v52 = vsel %vm433_vm10, %v428_v49, %v429_v46 }
 0x187   :  { %v1762_v59 = vpack.c.bf16 %v436_v40, %v436_v40  ;;  %v1763_v30 = vpack.c.bf16 %v435_v52, %v435_v52  ;;  %v1778_v61 = vpack.c.bf16 %v582_v36, %v582_v36  ;;  %v728_v38 = vsel %vm725_vm13, %v721_v33, %v722_v57 }
 0x188   :  { %798 = vrot.lane.b32.xlu0 %v1786_v10, %s2072_s24  ;;  %v1779_v18 = vpack.c.bf16 %v2535_v15, %v2535_v15  ;;  %v1794_v63 = vpack.c.bf16 %v728_v38, %v728_v38  ;;  %v1795_v62 = vpack.c.bf16 %v2523_v2, %v2523_v2  ;;  %v1780_v45 = vpack.c.bf16 %v2539_v9, %v2539_v9 }
 0x189   :  { %v1781_v1 = vpack.c.bf16 %v2545_v6, %v2545_v6  ;;  %v1796_v22 = vpack.c.bf16 %v2528_v53, %v2528_v53  ;;  %v1797_v57 = vpack.c.bf16 %v2558_v0, %v2558_v0  ;;  %vm1480_vm8 = vcmask 1047559  }
 0x18a   :  { %804 = vrot.lane.b32.xlu1 %v1789_v26, %s2072_s24 }
 0x18c   :  { %518 = vrot.lane.b32.xlu0 %v1760_v16, %s2071_s1 }
 0x18e   :  { %516 = vrot.lane.b32.xlu1 %v1759_v20, %s2071_s1 }
 0x190   :  { %664 = vrot.lane.b32.xlu0 %v1776_v56, %s2067_s27 }
 0x192   :  { %662 = vrot.lane.b32.xlu1 %v1775_v5, %s2067_s27 }
 0x194   :  { %810 = vrot.lane.b32.xlu0 %v1792_v28, %s2072_s24 }
 0x196   :  { %808 = vrot.lane.b32.xlu1 %v1791_v32, %s2072_s24 }
 0x198   :  { %514 = vrot.lane.b32.xlu0 %v1758_v34, %s2071_s1 }
 0x19a   :  { %520 = vrot.lane.b32.xlu1 %v1761_v42, %s2071_s1  ;;  %v2001_v42 = vld [vmem:[#allocation2 + $0x34] ss:$8 sps:$4 sm:$0xff]  }
 0x19c   :  { %660 = vrot.lane.b32.xlu0 %v1774_v43, %s2067_s27 }
 0x19e   :  { %666 = vrot.lane.b32.xlu1 %v1777_v55, %s2067_s27 }
 0x1a0   :  { %806 = vrot.lane.b32.xlu0 %v1790_v48, %s2072_s24 }
 0x1a2   :  { %812 = vrot.lane.b32.xlu1 %v1793_v54, %s2072_s24 }
 0x1a4   :  { %526 = vrot.lane.b32.xlu0 %v1764_v58, %s2071_s1 }
 0x1a6   :  { %528 = vrot.lane.b32.xlu1 %v1765_v60, %s2071_s1 }
 0x1a8   :  { %522 = vrot.lane.b32.xlu0 %v1762_v59, %s2071_s1  ;;  %v2003_v59 = vld [vmem:[#allocation2 + $0x44] ss:$8 sps:$4 sm:$0xff]  }
 0x1aa   :  { %524 = vrot.lane.b32.xlu1 %v1763_v30, %s2071_s1  ;;  %v2006_v30 = vld [vmem:[#allocation2 + $0x54] ss:$8 sps:$4 sm:$0xff]  }
 0x1ac   :  { %668 = vrot.lane.b32.xlu0 %v1778_v61, %s2067_s27 }
 0x1ae   :  { %670 = vrot.lane.b32.xlu1 %v1779_v18, %s2067_s27 }
 0x1b0   :  { %814 = vrot.lane.b32.xlu0 %v1794_v63, %s2072_s24 }
 0x1b2   :  { %816 = vrot.lane.b32.xlu1 %v1795_v62, %s2072_s24 }
 0x1b4   :  { %672 = vrot.lane.b32.xlu0 %v1780_v45, %s2067_s27 }
 0x1b6   :  { %674 = vrot.lane.b32.xlu1 %v1781_v1, %s2067_s27 }
 0x1b8   :  { %818 = vrot.lane.b32.xlu0 %v1796_v22, %s2072_s24 }
 0x1ba   :  { %820 = vrot.lane.b32.xlu1 %v1797_v57, %s2072_s24 }
 0x1ce   :  { %v503_v2 = vpop.permute.xlu0 %502 }
 0x1cf   :  { %549 = vst.msk [vmem:[#allocation2 + $0x10] sm:$0xf] %vm546_vm14, %v503_v2 }
 0x1d0   :  { %v501_v3 = vpop.permute.xlu1 %500 }
 0x1d1   :  { %548 = vst.msk [vmem:[#allocation2 + $0x8] sm:$0xf] %vm546_vm14, %v501_v3 }
 0x1d2   :  { %v649_v15 = vpop.permute.xlu0 %648 }
 0x1d3   :  { %695 = vst.msk [vmem:[#allocation2 + $0x10] sm:$0xf] %vm692_vm15, %v649_v15  ;;  %v2008_v15 = vld [vmem:[#allocation2 + $0x64] ss:$8 sps:$4 sm:$0xff]  }
 0x1d4   :  { %v647_v53 = vpop.permute.xlu1 %646 }
 0x1d5   :  { %694 = vst.msk [vmem:[#allocation2 + $0x8] sm:$0xf] %vm692_vm15, %v647_v53 }
 0x1d6   :  { %v795_v29 = vpop.permute.xlu0 %794 }
 0x1d7   :  { %841 = vst.msk [vmem:[#allocation2 + $0x10] sm:$0xf] %vm838_vm0, %v795_v29  ;;  %v2011_v29 = vld [vmem:[#allocation2 + $0x74] ss:$8 sps:$4 sm:$0xff]  }
 0x1d8   :  { %v793_v9 = vpop.permute.xlu1 %792 }
 0x1d9   :  { %840 = vst.msk [vmem:[#allocation2 + $0x8] sm:$0xf] %vm838_vm0, %v793_v9 }
 0x1da   :  { %v499_v6 = vpop.permute.xlu0 %498 }
 0x1db   :  { %547 = vst.msk [vmem:[#allocation2] sm:$0xf] %vm546_vm14, %v499_v6  ;;  %v2014_v6 = vld [vmem:[%s2785_s5 + $0x38] sm:$0xff]  }
 0x1dc   :  { %v505_v8 = vpop.permute.xlu1 %504 }
 0x1dd   :  { %550 = vst.msk [vmem:[#allocation2 + $0x18] sm:$0xf] %vm546_vm14, %v505_v8  ;;  %v2073_v8 = vmov 0.0  }
 0x1de   :  { %v645_v10 = vpop.permute.xlu0 %644  ;;  %v987_v21 = vld [vmem:[#allocation2 + $0x10] sm:$0xff]  ;;  %1939 = vmatprep.subr.bf16.mxu0 %v2073_v8  ;;  %1955 = vmatprep.mubr.msk.bf16.mxu0 %vm2074_vm1, %v2073_v8 }
 0x1df   :  { %693 = vst.msk [vmem:[#allocation2] sm:$0xf] %vm692_vm15, %v645_v10  ;;  %1940 = vmatpush3.bf16.msra.mxu0 %v2014_v6  ;;  %v2015_v10 = vld [vmem:[%s2785_s5 + $0x30] sm:$0xff]  }
 0x1e0   :  { %v651_v11 = vpop.permute.xlu1 %650  ;;  %1941 = vmatprep.subr.bf16.mxu0 %v2073_v8 }
 0x1e1   :  { %696 = vst.msk [vmem:[#allocation2 + $0x18] sm:$0xf] %vm692_vm15, %v651_v11  ;;  %v2016_v11 = vld [vmem:[%s2785_s5 + $0x28] sm:$0xff]  }
 0x1e2   :  { %v791_v0 = vpop.permute.xlu0 %790 }
 0x1e3   :  { %839 = vst.msk [vmem:[#allocation2] sm:$0xf] %vm838_vm0, %v791_v0  ;;  %1942 = vmatpush3.bf16.msra.mxu0 %v2015_v10  ;;  %v2017_v0 = vld [vmem:[%s2785_s5 + $0x20] sm:$0xff]  }
 0x1e4   :  { %v797_v12 = vpop.permute.xlu1 %796  ;;  %1943 = vmatprep.subr.bf16.mxu0 %v2073_v8 }
 0x1e5   :  { %842 = vst.msk [vmem:[#allocation2 + $0x18] sm:$0xf] %vm838_vm0, %v797_v12  ;;  %v2018_v12 = vld [vmem:[%s2785_s5 + $0x18] sm:$0xff]  }
 0x1e6   :  { %v511_v13 = vpop.permute.xlu0 %510 }
 0x1e7   :  { %553 = vst.msk [vmem:[#allocation2 + $0x30] sm:$0xf] %vm546_vm14, %v511_v13  ;;  %1944 = vmatpush3.bf16.msra.mxu0 %v2016_v11  ;;  %v2019_v13 = vld [vmem:[%s2785_s5 + $0x10] sm:$0xff]  }
 0x1e8   :  { %v509_v4 = vpop.permute.xlu1 %508  ;;  %1945 = vmatprep.subr.bf16.mxu0 %v2073_v8 }
 0x1e9   :  { %552 = vst.msk [vmem:[#allocation2 + $0x28] sm:$0xf] %vm546_vm14, %v509_v4  ;;  %v2020_v4 = vld [vmem:[%s2785_s5 + $0x8] sm:$0xff]  }
 0x1ea   :  { %v657_v26 = vpop.permute.xlu0 %656  ;;  %v1993_v16 = vld [vmem:[#allocation2] ss:$8 sps:$4 sm:$0xff]  }
 0x1eb   :  { %699 = vst.msk [vmem:[#allocation2 + $0x30] sm:$0xf] %vm692_vm15, %v657_v26  ;;  %1242 = vmatmul.mubr.bf16.vlgmr.msra.gmra.mxu1 %v1993_v16  ;;  %1946 = vmatpush3.bf16.msra.mxu0 %v2017_v0  ;;  %v2021_v26 = vld [vmem:[%s2785_s5] sm:$0xff]  }
 0x1ec   :  { %v655_v17 = vpop.permute.xlu1 %654  ;;  %1249 = vmatprep.mubr.bf16.mxu1 %v1996_v23  ;;  %v988_v7 = vld [vmem:[#allocation2 + $0x18] sm:$0xff]  ;;  %1947 = vmatprep.subr.bf16.mxu0 %v2073_v8 }
 0x1ed   :  { %698 = vst.msk [vmem:[#allocation2 + $0x28] sm:$0xf] %vm692_vm15, %v655_v17  ;;  %v1694_v24 = vcombine.low %v987_v21, %v988_v7 }
 0x1ee   :  { %v803_v19 = vpop.permute.xlu0 %802 }
 0x1ef   :  { %845 = vst.msk [vmem:[#allocation2 + $0x30] sm:$0xf] %vm838_vm0, %v803_v19  ;;  %1948 = vmatpush3.bf16.msra.mxu0 %v2018_v12 }
 0x1f0   :  { %v801_v20 = vpop.permute.xlu1 %800  ;;  %1949 = vmatprep.subr.bf16.mxu0 %v2073_v8 }
 0x1f1   :  { %844 = vst.msk [vmem:[#allocation2 + $0x28] sm:$0xf] %vm838_vm0, %v801_v20 }
 0x1f2   :  { %v507_v56 = vpop.permute.xlu0 %506 }
 0x1f3   :  { %551 = vst.msk [vmem:[#allocation2 + $0x20] sm:$0xf] %vm546_vm14, %v507_v56  ;;  %1250 = vmatmul.mubr.bf16.gmra.mxu1 %v1694_v24  ;;  %1950 = vmatpush3.bf16.msra.mxu0 %v2019_v13 }
 0x1f4   :  { %v513_v44 = vpop.permute.xlu1 %512  ;;  %1257 = vmatprep.mubr.bf16.mxu1 %v1998_v35  ;;  %1951 = vmatprep.subr.bf16.mxu0 %v2073_v8 }
 0x1f5   :  { %554 = vst.msk [vmem:[#allocation2 + $0x38] sm:$0xf] %vm546_vm14, %v513_v44 }
 0x1f6   :  { %v653_v5 = vpop.permute.xlu0 %652  ;;  %v991_v46 = vld [vmem:[#allocation2 + $0x30] sm:$0xff] }
 0x1f7   :  { %697 = vst.msk [vmem:[#allocation2 + $0x20] sm:$0xf] %vm692_vm15, %v653_v5  ;;  %1952 = vmatpush3.bf16.msra.mxu0 %v2020_v4 }
 0x1f8   :  { %v659_v25 = vpop.permute.xlu1 %658  ;;  %1953 = vmatprep.subr.bf16.mxu0 %v2073_v8 }
 0x1f9   :  { %700 = vst.msk [vmem:[#allocation2 + $0x38] sm:$0xf] %vm692_vm15, %v659_v25 }
 0x1fa   :  { %v799_v28 = vpop.permute.xlu0 %798 }
 0x1fb   :  { %843 = vst.msk [vmem:[#allocation2 + $0x20] sm:$0xf] %vm838_vm0, %v799_v28  ;;  %1954 = vmatpush3.bf16.msra.mxu0 %v2021_v26 }
 0x1fc   :  { %v805_v31 = vpop.permute.xlu1 %804 }
 0x1fd   :  { %846 = vst.msk [vmem:[#allocation2 + $0x38] sm:$0xf] %vm838_vm0, %v805_v31 }
 0x1fe   :  { %v519_v14 = vpop.permute.xlu0 %518 }
 0x1ff   :  { %557 = vst.msk [vmem:[#allocation2 + $0x50] sm:$0xf] %vm546_vm14, %v519_v14 }
 0x200   :  { %v517_v32 = vpop.permute.xlu1 %516 }
 0x201   :  { %556 = vst.msk [vmem:[#allocation2 + $0x48] sm:$0xf] %vm546_vm14, %v517_v32 }
 0x202   :  { %v665_v34 = vpop.permute.xlu0 %664  ;;  %v2000_v39 = vld [vmem:[#allocation2 + $0x20] ss:$8 sps:$4 sm:$0xff]  }
 0x203   :  { %703 = vst.msk [vmem:[#allocation2 + $0x50] sm:$0xf] %vm692_vm15, %v665_v34  ;;  %1258 = vmatmul.mubr.bf16.gmra.mxu1 %v2000_v39 }
 0x204   :  { %v663_v41 = vpop.permute.xlu1 %662  ;;  %1265 = vmatprep.mubr.bf16.mxu1 %v2001_v42  ;;  %v992_v43 = vld [vmem:[#allocation2 + $0x38] sm:$0xff] }
 0x205   :  { %702 = vst.msk [vmem:[#allocation2 + $0x48] sm:$0xf] %vm692_vm15, %v663_v41  ;;  %v1698_v55 = vcombine.low %v991_v46, %v992_v43  ;;  %v2733_v46 = vld [vmem:[%s2783_s3] ss:$0 sm:$0xff] }
 0x206   :  { %v811_v33 = vpop.permute.xlu0 %810 }
 0x207   :  { %849 = vst.msk [vmem:[#allocation2 + $0x50] sm:$0xf] %vm838_vm0, %v811_v33 }
 0x208   :  { %v809_v47 = vpop.permute.xlu1 %808 }
 0x209   :  { %848 = vst.msk [vmem:[#allocation2 + $0x48] sm:$0xf] %vm838_vm0, %v809_v47 }
 0x20a   :  { %v515_v51 = vpop.permute.xlu0 %514 }
 0x20b   :  { %555 = vst.msk [vmem:[#allocation2 + $0x40] sm:$0xf] %vm546_vm14, %v515_v51  ;;  %1266 = vmatmul.mubr.bf16.gmra.mxu1 %v1698_v55 }
 0x20c   :  { %v521_v48 = vpop.permute.xlu1 %520  ;;  %1273 = vmatprep.mubr.bf16.mxu1 %v2003_v59 }
 0x20d   :  { %558 = vst.msk [vmem:[#allocation2 + $0x58] sm:$0xf] %vm546_vm14, %v521_v48 }
 0x20e   :  { %v661_v37 = vpop.permute.xlu0 %660  ;;  %v995_v63 = vld [vmem:[#allocation2 + $0x50] sm:$0xff] }
 0x20f   :  { %701 = vst.msk [vmem:[#allocation2 + $0x40] sm:$0xf] %vm692_vm15, %v661_v37 }
 0x210   :  { %v667_v49 = vpop.permute.xlu1 %666 }
 0x211   :  { %704 = vst.msk [vmem:[#allocation2 + $0x58] sm:$0xf] %vm692_vm15, %v667_v49 }
 0x212   :  { %v807_v27 = vpop.permute.xlu0 %806 }
 0x213   :  { %847 = vst.msk [vmem:[#allocation2 + $0x40] sm:$0xf] %vm838_vm0, %v807_v27 }
 0x214   :  { %v813_v54 = vpop.permute.xlu1 %812 }
 0x215   :  { %850 = vst.msk [vmem:[#allocation2 + $0x58] sm:$0xf] %vm838_vm0, %v813_v54 }
 0x216   :  { %v527_v58 = vpop.permute.xlu0 %526 }
 0x217   :  { %561 = vst.msk [vmem:[#allocation2 + $0x70] sm:$0xf] %vm546_vm14, %v527_v58 }
 0x218   :  { %v529_v40 = vpop.permute.xlu1 %528 }
 0x219   :  { %562 = vst.msk [vmem:[#allocation2 + $0x78] sm:$0xf] %vm546_vm14, %v529_v40 }
 0x21a   :  { %v523_v60 = vpop.permute.xlu0 %522  ;;  %v2005_v52 = vld [vmem:[#allocation2 + $0x40] ss:$8 sps:$4 sm:$0xff]  }
 0x21b   :  { %559 = vst.msk [vmem:[#allocation2 + $0x60] sm:$0xf] %vm546_vm14, %v523_v60  ;;  %1274 = vmatmul.mubr.bf16.gmra.mxu1 %v2005_v52 }
 0x21c   :  { %v525_v36 = vpop.permute.xlu1 %524  ;;  %1281 = vmatprep.mubr.bf16.mxu1 %v2006_v30  ;;  %v996_v38 = vld [vmem:[#allocation2 + $0x58] sm:$0xff] }
 0x21d   :  { %560 = vst.msk [vmem:[#allocation2 + $0x68] sm:$0xf] %vm546_vm14, %v525_v36  ;;  %v1702_v45 = vcombine.low %v995_v63, %v996_v38  ;;  %v1815_v36 = vld [vmem:[%s2784_s4] sm:$0xff]  }
 0x21e   :  { %v669_v61 = vpop.permute.xlu0 %668  ;;  %v2746_v38 = vunpack.c.h.bf16 %v1815_v36 }
 0x21f   :  { %705 = vst.msk [vmem:[#allocation2 + $0x60] sm:$0xf] %vm692_vm15, %v669_v61 }
 0x220   :  { %v671_v18 = vpop.permute.xlu1 %670 }
 0x221   :  { %706 = vst.msk [vmem:[#allocation2 + $0x68] sm:$0xf] %vm692_vm15, %v671_v18 }
 0x222   :  { %v815_v62 = vpop.permute.xlu0 %814 }
 0x223   :  { %851 = vst.msk [vmem:[#allocation2 + $0x60] sm:$0xf] %vm838_vm0, %v815_v62  ;;  %1282 = vmatmul.mubr.bf16.gmra.mxu1 %v1702_v45 }
 0x224   :  { %v817_v1 = vpop.permute.xlu1 %816  ;;  %1289 = vmatprep.mubr.bf16.mxu1 %v2008_v15 }
 0x225   :  { %852 = vst.msk [vmem:[#allocation2 + $0x68] sm:$0xf] %vm838_vm0, %v817_v1 }
 0x226   :  { %v673_v22 = vpop.permute.xlu0 %672 }
 0x227   :  { %707 = vst.msk [vmem:[#allocation2 + $0x70] sm:$0xf] %vm692_vm15, %v673_v22 }
 0x228   :  { %v675_v57 = vpop.permute.xlu1 %674 }
 0x229   :  { %708 = vst.msk [vmem:[#allocation2 + $0x78] sm:$0xf] %vm692_vm15, %v675_v57 }
 0x22a   :  { %v819_v2 = vpop.permute.xlu0 %818 }
 0x22b   :  { %853 = vst.msk [vmem:[#allocation2 + $0x70] sm:$0xf] %vm838_vm0, %v819_v2 }
 0x22c   :  { %v821_v3 = vpop.permute.xlu1 %820  ;;  %v2010_v53 = vld [vmem:[#allocation2 + $0x60] ss:$8 sps:$4 sm:$0xff]  }
 0x22d   :  { %854 = vst.msk [vmem:[#allocation2 + $0x78] sm:$0xf] %vm838_vm0, %v821_v3  ;;  %1290 = vmatmul.mubr.bf16.gmra.mxu1 %v2010_v53  ;;  %v2750_v3 = vunpack.c.l.bf16 %v1815_v36 }
 0x22e   :  { %1297 = vmatprep.mubr.bf16.mxu1 %v2011_v29 }
 0x234   :  { %v2013_v9 = vld [vmem:[#allocation2 + $0x70] ss:$8 sps:$4 sm:$0xff]  }
 0x235   :  { %1298 = vmatmul.mubr.bf16.gmra.mxu1 %v2013_v9 }
 0x2ab   :  { %v1850_v16 = vpop.f32.mrf.mxu1 }
 0x2ad   :  { %v1851_v50 = vpop.f32.mrf.mxu1 }
 0x2ae   :  { %v1852_v42 = vadd.f32 %v1851_v50, %v1850_v16 }
 0x2af   :  { %v1853_v17 = vpop.f32.mrf.mxu1 }
 0x2b0   :  { %v1313_v40 = vadd.f32 %v1852_v42, %v2733_v46 }
 0x2b1   :  { %v1854_v23 = vpop.f32.mrf.mxu1 }
 0x2b2   :  { %v1855_v39 = vadd.f32 %v1854_v23, %v1853_v17  ;;  %v1329_v2 = vmax.f32 %v1313_v40, 0.0 }
 0x2b3   :  { %v1856_v19 = vpop.f32.mrf.mxu1 }
 0x2b4   :  { %v1314_v49 = vadd.f32 %v1855_v39, %v2733_v46  ;;  %v1349_v16 = vmul.f32 %v2750_v3, %v1329_v2 }
 0x2b5   :  { %v1857_v7 = vpop.f32.mrf.mxu1 }
 0x2b6   :  { %v1858_v33 = vadd.f32 %v1857_v7, %v1856_v19  ;;  %v1330_v45 = vmax.f32 %v1314_v49, 0.0 }
 0x2b7   :  { %v1859_v20 = vpop.f32.mrf.mxu1 }
 0x2b8   :  { %v1315_v60 = vadd.f32 %v1858_v33, %v2733_v46  ;;  %v1350_v12 = vmul.f32 %v2746_v38, %v1330_v45 }
 0x2b9   :  { %v1860_v21 = vpop.f32.mrf.mxu1 }
 0x2ba   :  { %v1861_v34 = vadd.f32 %v1860_v21, %v1859_v20  ;;  %v1331_v15 = vmax.f32 %v1315_v60, 0.0 }
 0x2bc   :  { %v1316_v55 = vadd.f32 %v1861_v34, %v2733_v46  ;;  %v1351_v50 = vmul.f32 %v2750_v3, %v1331_v15 }
 0x2be   :  { %v1332_v18 = vmax.f32 %v1316_v55, 0.0 }
 0x2c0   :  { %v1352_v10 = vmul.f32 %v2746_v38, %v1332_v18 }
 0x2c2   :  { %v1372_v21 = vmax.f32 %v1351_v50, %v1352_v10 }
 0x2c3   :  { %v1862_v56 = vpop.f32.mrf.mxu1 }
 0x2c4   :  { %v1373_v39 = vrot.slane %v1372_v21, 4 }
 0x2c5   :  { %v1863_v24 = vpop.f32.mrf.mxu1 }
 0x2c6   :  { %v1864_v51 = vadd.f32 %v1863_v24, %v1862_v56  ;;  %v1365_v24 = vmax.f32 %v1349_v16, %v1350_v12  ;;  %v1374_v49 = vmax.f32 %v1372_v21, %v1373_v39 }
 0x2c7   :  { %v1865_v44 = vpop.f32.mrf.mxu1 }
 0x2c8   :  { %v1317_v30 = vadd.f32 %v1864_v51, %v2733_v46  ;;  %v1366_v42 = vrot.slane %v1365_v24, 4  ;;  %v1375_v18 = vrot.slane %v1374_v49, 2 }
 0x2c9   :  { %v1866_v5 = vpop.f32.mrf.mxu1 }
 0x2ca   :  { %v1867_v41 = vadd.f32 %v1866_v5, %v1865_v44  ;;  %v1333_v9 = vmax.f32 %v1317_v30, 0.0 }
 0x2cb   :  { %v1868_v25 = vpop.f32.mrf.mxu1 }
 0x2cc   :  { %v1318_v27 = vadd.f32 %v1867_v41, %v2733_v46  ;;  %v1353_v23 = vmul.f32 %v2750_v3, %v1333_v9 }
 0x2cd   :  { %v1869_v28 = vpop.f32.mrf.mxu1 }
 0x2ce   :  { %v1870_v48 = vadd.f32 %v1869_v28, %v1868_v25  ;;  %v1334_v1 = vmax.f32 %v1318_v27, 0.0 }
 0x2cf   :  { %v1871_v31 = vpop.f32.mrf.mxu1 }
 0x2d0   :  { %v1319_v63 = vadd.f32 %v1870_v48, %v2733_v46  ;;  %v1354_v13 = vmul.f32 %v2746_v38, %v1334_v1 }
 0x2d1   :  { %v1872_v14 = vpop.f32.mrf.mxu1 }
 0x2d2   :  { %v1873_v43 = vadd.f32 %v1872_v14, %v1871_v31  ;;  %v1335_v11 = vmax.f32 %v1319_v63, 0.0  ;;  %v1379_v44 = vmax.f32 %v1353_v23, %v1354_v13 }
 0x2d4   :  { %v1320_v59 = vadd.f32 %v1873_v43, %v2733_v46  ;;  %v1355_v56 = vmul.f32 %v2750_v3, %v1335_v11  ;;  %v1380_v33 = vrot.slane %v1379_v44, 4 }
 0x2d6   :  { %v1336_v53 = vmax.f32 %v1320_v59, 0.0  ;;  %v1381_v40 = vmax.f32 %v1379_v44, %v1380_v33 }
 0x2d8   :  { %v1356_v17 = vmul.f32 %v2746_v38, %v1336_v53 }
 0x2da   :  { %v1386_v31 = vmax.f32 %v1355_v56, %v1356_v17 }
 0x2db   :  { %v1874_v32 = vpop.f32.mrf.mxu1 }
 0x2dc   :  { %v1387_v51 = vrot.slane %v1386_v31, 4 }
 0x2dd   :  { %v1875_v35 = vpop.f32.mrf.mxu1 }
 0x2de   :  { %v1876_v54 = vadd.f32 %v1875_v35, %v1874_v32  ;;  %v1388_v59 = vmax.f32 %v1386_v31, %v1387_v51 }
 0x2df   :  { %v1877_v47 = vpop.f32.mrf.mxu1 }
 0x2e0   :  { %v1321_v22 = vadd.f32 %v1876_v54, %v2733_v46  ;;  %v1389_v2 = vrot.slane %v1388_v59, 2 }
 0x2e1   :  { %v1878_v37 = vpop.f32.mrf.mxu1 }
 0x2e2   :  { %v1879_v58 = vadd.f32 %v1878_v37, %v1877_v47  ;;  %v1337_v4 = vmax.f32 %v1321_v22, 0.0  ;;  %v1382_v22 = vrot.slane %v1381_v40, 2 }
 0x2e3   :  { %v1880_v52 = vpop.f32.mrf.mxu1 }
 0x2e4   :  { %v1322_v61 = vadd.f32 %v1879_v58, %v2733_v46  ;;  %v1357_v5 = vmul.f32 %v2750_v3, %v1337_v4  ;;  %v1367_v58 = vmax.f32 %v1365_v24, %v1366_v42  ;;  %v1383_v13 = vmax.f32 %v1381_v40, %v1382_v22 }
 0x2e5   :  { %v1881_v62 = vpop.f32.mrf.mxu1  ;;  %v1390_v4 = vmax.f32 %v1388_v59, %v1389_v2 }
 0x2e6   :  { %v1882_v57 = vadd.f32 %v1881_v62, %v1880_v52  ;;  %v1338_v6 = vmax.f32 %v1322_v61, 0.0  ;;  %v1368_v1 = vrot.slane %v1367_v58, 2  ;;  %v1384_v56 = vrot.slane %v1383_v13, 1 }
 0x2e7   :  { %v1883_v29 = vpop.f32.mrf.mxu1  ;;  %v1391_v24 = vrot.slane %v1390_v4, 1 }
 0x2e8   :  { %v1323_v8 = vadd.f32 %v1882_v57, %v2733_v46  ;;  %v1358_v19 = vmul.f32 %v2746_v38, %v1338_v6  ;;  %v1369_v12 = vmax.f32 %v1367_v58, %v1368_v1 }
 0x2e9   :  { %v1884_v0 = vpop.f32.mrf.mxu1  ;;  %v1392_v39 = vmax.f32 %v1390_v4, %v1391_v24 }
 0x2ea   :  { %v1885_v26 = vadd.f32 %v1884_v0, %v1883_v29  ;;  %v1339_v7 = vmax.f32 %v1323_v8, 0.0  ;;  %v1393_v14 = vmax.f32 %v1357_v5, %v1358_v19  ;;  %v1376_v8 = vmax.f32 %v1374_v49, %v1375_v18 }
 0x2eb   :  { %v1370_v21 = vrot.slane %v1369_v12, 1 }
 0x2ec   :  { %v1324_v20 = vadd.f32 %v1885_v26, %v2733_v46  ;;  %v1359_v32 = vmul.f32 %v2750_v3, %v1339_v7  ;;  %v1394_v48 = vrot.slane %v1393_v14, 4  ;;  %v1377_v23 = vrot.slane %v1376_v8, 1 }
 0x2ed   :  { %v1886_v28 = vpop.f32.mrf.mxu1 }
 0x2ee   :  { %v1340_v25 = vmax.f32 %v1324_v20, 0.0  ;;  %v1395_v30 = vmax.f32 %v1393_v14, %v1394_v48  ;;  %v1378_v31 = vmax.f32 %v1376_v8, %v1377_v23 }
 0x2ef   :  { %v1887_v35 = vpop.f32.mrf.mxu1 }
 0x2f0   :  { %v1360_v34 = vmul.f32 %v2746_v38, %v1340_v25  ;;  %v1888_v41 = vadd.f32 %v1887_v35, %v1886_v28  ;;  %v1396_v9 = vrot.slane %v1395_v30, 2  ;;  %v1385_v35 = vmax.f32 %v1383_v13, %v1384_v56 }
 0x2f1   :  { %v1889_v47 = vpop.f32.mrf.mxu1 }
 0x2f2   :  { %v1400_v43 = vmax.f32 %v1359_v32, %v1360_v34  ;;  %v1325_v55 = vadd.f32 %v1888_v41, %v2733_v46  ;;  %v1397_v17 = vmax.f32 %v1395_v30, %v1396_v9 }
 0x2f3   :  { %v1890_v37 = vpop.f32.mrf.mxu1 }
 0x2f4   :  { %v1401_v27 = vrot.slane %v1400_v43, 4  ;;  %v1891_v54 = vadd.f32 %v1890_v37, %v1889_v47  ;;  %v1341_v52 = vmax.f32 %v1325_v55, 0.0  ;;  %v1398_v28 = vrot.slane %v1397_v17, 1 }
 0x2f5   :  { %v1892_v60 = vpop.f32.mrf.mxu1  ;;  %v1423_v55 = vpack.c.bf16 %v1385_v35, %v1385_v35 }
 0x2f6   :  { %v1326_v36 = vadd.f32 %v1891_v54, %v2733_v46  ;;  %v1402_v63 = vmax.f32 %v1400_v43, %v1401_v27  ;;  %v1361_v15 = vmul.f32 %v2750_v3, %v1341_v52  ;;  %v1399_v33 = vmax.f32 %v1397_v17, %v1398_v28 }
 0x2f7   :  { %v1893_v61 = vpop.f32.mrf.mxu1  ;;  %v1422_v43 = vpack.c.bf16 %v1378_v31, %v1378_v31  ;;  %v1462_v40 = vunpack.c.l.b16 %v1423_v55 }
 0x2f8   :  { %v1342_v62 = vmax.f32 %v1326_v36, 0.0  ;;  %v1894_v45 = vadd.f32 %v1893_v61, %v1892_v60  ;;  %v1403_v10 = vrot.slane %v1402_v63, 2 }
 0x2f9   :  { %v1895_v57 = vpop.f32.mrf.mxu1  ;;  %v1461_v27 = vunpack.c.l.b16 %v1422_v43 }
 0x2fa   :  { %v1362_v53 = vmul.f32 %v2746_v38, %v1342_v62  ;;  %v1327_v29 = vadd.f32 %v1894_v45, %v2733_v46  ;;  %v1404_v19 = vmax.f32 %v1402_v63, %v1403_v10 }
 0x2fb   :  { %v1896_v6 = vpop.f32.mrf.mxu1 }
 0x2fc   :  { %v1407_v11 = vmax.f32 %v1361_v15, %v1362_v53  ;;  %v1897_v0 = vadd.f32 %v1896_v6, %v1895_v57  ;;  %v1343_v16 = vmax.f32 %v1327_v29, 0.0  ;;  %v1405_v14 = vrot.slane %v1404_v19, 1  ;;  %v1725_v6 = vld [vmem:[%s2786_s6] ss:$0 sm:$0xff] }
 0x2fe   :  { %v1408_v26 = vrot.slane %v1407_v11, 4  ;;  %v1328_v50 = vadd.f32 %v1897_v0, %v2733_v46  ;;  %v1363_v5 = vmul.f32 %v2750_v3, %v1343_v16  ;;  %v1371_v46 = vmax.f32 %v1369_v12, %v1370_v21 }
 0x2ff   :  { %v1406_v47 = vmax.f32 %v1404_v19, %v1405_v14  ;;  %v1424_v3 = vpack.c.bf16 %v1392_v39, %v1392_v39 }
 0x300   :  { %v1409_v7 = vmax.f32 %v1407_v11, %v1408_v26  ;;  %v1344_v20 = vmax.f32 %v1328_v50, 0.0  ;;  %v1421_v37 = vpack.c.bf16 %v1371_v46, %v1371_v46 }
 0x301   :  { %v1426_v54 = vpack.c.bf16 %v1406_v47, %v1406_v47  ;;  %v1463_v52 = vunpack.c.l.b16 %v1424_v3 }
 0x302   :  { %v1410_v44 = vrot.slane %v1409_v7, 2  ;;  %v1364_v25 = vmul.f32 %v2746_v38, %v1344_v20  ;;  %v1425_v38 = vpack.c.bf16 %v1399_v33, %v1399_v33  ;;  %v1460_v59 = vunpack.c.l.b16 %v1421_v37 }
 0x303   :  { %v1465_v18 = vunpack.c.l.b16 %v1426_v54 }
 0x304   :  { %v1411_v32 = vmax.f32 %v1409_v7, %v1410_v44  ;;  %v1414_v34 = vmax.f32 %v1363_v5, %v1364_v25  ;;  %v1464_v30 = vunpack.c.l.b16 %v1425_v38  ;;  %v1469_v61 = vsel %vm1468_vm2, %v1461_v27, %v1460_v59 }
 0x305   :  { %v1471_v62 = vsel %vm1470_vm3, %v1462_v40, %v1469_v61 }
 0x306   :  { %v1412_v41 = vrot.slane %v1411_v32, 1  ;;  %v1415_v42 = vrot.slane %v1414_v34, 4  ;;  %v1473_v1 = vsel %vm1472_vm4, %v1463_v52, %v1471_v62 }
 0x307   :  { %v1475_v57 = vsel %vm1474_vm5, %v1464_v30, %v1473_v1 }
 0x308   :  { %v1416_v51 = vmax.f32 %v1414_v34, %v1415_v42  ;;  %v1413_v48 = vmax.f32 %v1411_v32, %v1412_v41  ;;  %v1477_v15 = vsel %vm1476_vm6, %v1465_v18, %v1475_v57 }
 0x30a   :  { %v1417_v49 = vrot.slane %v1416_v51, 2  ;;  %v1427_v60 = vpack.c.bf16 %v1413_v48, %v1413_v48 }
 0x30c   :  { %v1418_v58 = vmax.f32 %v1416_v51, %v1417_v49  ;;  %v1466_v45 = vunpack.c.l.b16 %v1427_v60 }
 0x30e   :  { %v1419_v36 = vrot.slane %v1418_v58, 1  ;;  %v1479_v53 = vsel %vm1478_vm7, %v1466_v45, %v1477_v15 }
 0x310   :  { %v1420_v63 = vmax.f32 %v1418_v58, %v1419_v36 }
 0x312   :  { %v1428_v22 = vpack.c.bf16 %v1420_v63, %v1420_v63 }
 0x314   :  { %v1467_v2 = vunpack.c.l.b16 %v1428_v22 }
 0x316   :  { %v1481_v29 = vsel %vm1480_vm8, %v1467_v2, %v1479_v53 }
 0x317   :  { %v1482_v9 = vpack.c.b16 %v1481_v29, %v1481_v29 }
 0x319   :  { %1956 = vmatmul.mubr.bf16.vlgmr.msra.gmra.mxu0 %v1482_v9 }
 0x3d9   :  { %v1566_v8 = vpop.f32.mrf.mxu0 }
 0x3da   :  { %v1567_v10 = vadd.f32 %v1725_v6, %v1566_v8 }
 0x3db   :  { %v1957_v11 = vpop.f32.mrf.mxu0 }
 0x3dc   :  { %1572 = vst [vmem:[#allocation6] sm:$0xff] %v1567_v10 }
 0x3dd   :  { %v1569_v0 = vpop.f32.mrf.mxu0 }
 0x3de   :  { %2053 = shalt.err (!%p2050_p9)
}
 0x3df   :  { %1582 = dma.vmem_to_hbm [thread:$0]  %s1580_s20, 128, %s2787_s7, [#allocation5]   ;;  %v1958_v12 = vpop.f32.mrf.mxu0 }
 0x3e0   :  { %2064 = dma.done.wait [#allocation5], 128  }
 0x3e1   :  { %2065 = vsyncadd [#allocation5], 4294967168 }
 0x3e2   :  { %1586 = vsyncpa [#allocation4], 1 }
 0x3e3   :  { %1587 = vsyncpa [#allocation5], 1 }

</bundles_post_ra>
